<compile_context>
chip_gen: v7x
topology: tpu7x:2x2x1
jax: 0.10.0
libtpu: 0.0.40
codegen_flags: <defaults>
</compile_context>

<pallas_src>
import numpy as np
import jax
import jax.numpy as jnp
from jax import lax
from jax.experimental import pallas as pl
from jax.experimental.pallas import tpu as pltpu

# ----------------------------- model config ---------------------------------
FIELD_DIMS = (8, 12, 6, 10)          # data['field_dims']
F = len(FIELD_DIMS)                  # num_fields
V = sum(FIELD_DIMS)                  # total vocab (all fields) = 36
VPAD = 128                           # vocab padded to a lane-friendly size
FFM_EMBED_DIM = 8                    # args.FFM_EMBED_DIM
DCN_EMBED_DIM = 16                   # args.DCN_EMBED_DIM
EMBED_OUT = 2 * DCN_EMBED_DIM        # len(field_dims[:2]) * DCN_EMBED_DIM = 32
NUM_CROSS_LAYERS = 3                 # args.num_layers
MLP_HIDDEN = 32                      # args.mlp_dims = (32,)  (single layer)
BN_EPS = 1e-5                        # PyTorch BatchNorm1d default eps
TB = 128                             # batch tile (rows per grid step)

_OFFSETS = np.array((0, *np.cumsum(FIELD_DIMS)[:-1]), dtype=np.int32)  # (0,8,20,26)


# ------------------------------- kernel --------------------------------------
def _ffdcn_kernel(idx_ref, bigq_ref, bigd_ref, blin_ref, cw_ref, cb_ref,
                  w1_ref, b1_ref, bn_ref, wcd_ref, wfin_ref, out_ref):
    tb = idx_ref.shape[0]
    gidx = idx_ref[...]                                   # (TB, F) int32, offsets added

    # Multi-hot over the padded joint vocab (fields have disjoint index
    # ranges, so this is exactly the sum of the per-field one-hots).
    lane = lax.broadcasted_iota(jnp.int32, (tb, VPAD), 1)
    mh = (gidx[:, 0:1] == lane).astype(jnp.float32)
    for f in range(1, F):
        mh = mh + (gidx[:, f:f + 1] == lane).astype(jnp.float32)

    # ---- FFM pair-sum + FeaturesLinear in one MXU pass:
    #   ffx = mh^T BigQ mh + bias = rowsum((mh @ BigQ) * mh) + bias
    r = jnp.dot(mh, bigq_ref[...], preferred_element_type=jnp.float32)   # (TB, VPAD)
    ffx = jnp.sum(r * mh, axis=1, keepdims=True) + blin_ref[...]         # (TB, 1)

    # ---- DCN embedding of the first two fields (already concatenated):
    embed_x = jnp.dot(mh, bigd_ref[...], preferred_element_type=jnp.float32)  # (TB, 32)

    # ---- CrossNetwork
    cw = cw_ref[...]                                      # (EMBED_OUT, L)
    cb = cb_ref[...]                                      # (L, EMBED_OUT)
    x0 = embed_x
    x = embed_x
    for l in range(NUM_CROSS_LAYERS):
        xw = jnp.dot(x, cw[:, l:l + 1], preferred_element_type=jnp.float32)  # (TB, 1)
        x = x0 * xw + cb[l:l + 1, :] + x

    # ---- MLP: Linear -> BatchNorm1d(eval, running stats) -> ReLU -> Dropout(id)
    # TODO(synk): training-mode BatchNorm (batch statistics) and Dropout masking
    # are not implemented; this is inference semantics.
    h = jnp.dot(embed_x, w1_ref[...], preferred_element_type=jnp.float32) + b1_ref[...]
    bn = bn_ref[...]                                      # (4, H): gamma, beta, mean, var
    gamma, beta, mean, var = bn[0:1, :], bn[1:2, :], bn[2:3, :], bn[3:4, :]
    scale = gamma * lax.rsqrt(var + BN_EPS)
    h = (h - mean) * scale + beta
    h = jnp.maximum(h, 0.0)

    # ---- cd_linear on concat([x_cross, x_deep]); split the weight instead of
    # concatenating activations (avoids a lane-concat relayout).
    wcd = wcd_ref[...]                                    # (EMBED_OUT + H, 1)
    p = (jnp.dot(x, wcd[:EMBED_OUT, :], preferred_element_type=jnp.float32) +
         jnp.dot(h, wcd[EMBED_OUT:, :], preferred_element_type=jnp.float32))

    # ---- final Linear(2, 1, bias=False) on concat([ffx, p])
    wfin = wfin_ref[...]                                  # (2, 1)
    out_ref[...] = ffx * wfin[0:1, :] + p * wfin[1:2, :]


# --------------------- weight-derived fused tables ----------------------------
def _build_fused_tables(wlin, tffm, tdcn):
    """Rewrite FFM + linear + DCN-embedding lookups as two small dense matrices.

    BigQ (VPAD, VPAD): block (field i rows, field j cols), i<j, holds
        <tffm[j][v], tffm[i][w]>; diagonal holds w_lin.  Then
        mh^T BigQ mh = ffm_term + linear_term.
    BigD (VPAD, EMBED_OUT): field-0 vocab rows carry tdcn in cols [0:D],
        field-1 vocab rows carry tdcn in cols [D:2D]; mh @ BigD = embed_x.
    """
    off = _OFFSETS
    bigq = jnp.zeros((VPAD, VPAD), jnp.float32)
    for i in range(F - 1):
        for j in range(i + 1, F):
            ri = slice(int(off[i]), int(off[i]) + FIELD_DIMS[i])
            rj = slice(int(off[j]), int(off[j]) + FIELD_DIMS[j])
            blk = tffm[j, ri] @ tffm[i, rj].T             # (d_i, d_j)
            bigq = bigq.at[ri, rj].set(blk)
    diag = jnp.zeros((VPAD,), jnp.float32).at[:V].set(wlin[:, 0])
    bigq = bigq + jnp.diag(diag)

    d0, d1 = FIELD_DIMS[0], FIELD_DIMS[1]
    bigd = jnp.zeros((VPAD, EMBED_OUT), jnp.float32)
    bigd = bigd.at[0:d0, 0:DCN_EMBED_DIM].set(tdcn[0:d0])
    bigd = bigd.at[d0:d0 + d1, DCN_EMBED_DIM:EMBED_OUT].set(tdcn[d0:d0 + d1])
    return bigq, bigd


# ------------------------------- wrapper --------------------------------------
def ffdcn_forward(ffx_idx, params, *, tile_batch=TB):
    """ffx_idx: int array (B, F) of per-field indices. Returns (B,) float32."""
    B, Fd = ffx_idx.shape
    assert Fd == F
    wlin, blin, tffm, tdcn, cw, cb, w1, b1, bn, wcd, wfin = params
    bigq, bigd = _build_fused_tables(wlin, tffm, tdcn)

    gidx = ffx_idx.astype(jnp.int32) + jnp.asarray(_OFFSETS)[None, :]
    pad = (-B) % tile_batch
    if pad:
        gidx = jnp.pad(gidx, ((0, pad), (0, 0)))          # padded rows are discarded
    Bp = gidx.shape[0]
    grid = Bp // tile_batch

    def full(arr):
        nd = arr.ndim
        return pl.BlockSpec(arr.shape, lambda i, _nd=nd: (0,) * _nd)

    out = pl.pallas_call(
        _ffdcn_kernel,
        out_shape=jax.ShapeDtypeStruct((Bp, 1), jnp.float32),
        grid_spec=pltpu.PrefetchScalarGridSpec(
            num_scalar_prefetch=0,
            grid=(grid,),
            in_specs=[
                pl.BlockSpec((tile_batch, F), lambda i: (i, 0)),
                full(bigq), full(bigd), full(blin),
                full(cw), full(cb), full(w1), full(b1), full(bn),
                full(wcd), full(wfin),
            ],
            out_specs=pl.BlockSpec((tile_batch, 1), lambda i: (i, 0)),
        ),
        compiler_params=pltpu.CompilerParams(
            dimension_semantics=("parallel",),
        ),
    )(gidx, bigq, bigd, blin, cw, cb, w1, b1, bn, wcd, wfin)
    return out[:B, 0]


# ---------------------------- pure-JAX reference ------------------------------
def ref_forward(ffx_idx, params):
    wlin, blin, tffm, tdcn, cw, cb, w1, b1, bn, wcd, wfin = params
    B = ffx_idx.shape[0]
    gidx = ffx_idx.astype(jnp.int32) + jnp.asarray(_OFFSETS)[None, :]

    lin = jnp.sum(wlin[gidx], axis=1) + blin              # (B, 1)
    xs = [tffm[k][gidx] for k in range(F)]                # each (B, F, E)
    ffm = jnp.zeros((B, 1), jnp.float32)
    for i in range(F - 1):
        for j in range(i + 1, F):
            ffm = ffm + jnp.sum(xs[j][:, i] * xs[i][:, j], axis=1, keepdims=True)
    ffx_s = lin + ffm

    embed_x = tdcn[gidx[:, :2]].reshape(B, EMBED_OUT)
    x0 = embed_x
    x = embed_x
    for l in range(NUM_CROSS_LAYERS):
        xw = x @ cw[:, l:l + 1]
        x = x0 * xw + cb[l][None, :] + x

    h = embed_x @ w1 + b1
    gamma, beta, mean, var = bn[0:1], bn[1:2], bn[2:3], bn[3:4]
    h = gamma * (h - mean) / jnp.sqrt(var + BN_EPS) + beta
    h = jnp.maximum(h, 0.0)

    p = jnp.concatenate([x, h], axis=1) @ wcd
    out = jnp.concatenate([ffx_s, p], axis=1) @ wfin
    return out[:, 0]


# --------------------------------- demo ---------------------------------------
if __name__ == "__main__":
    key = jax.random.PRNGKey(0)
    ks = jax.random.split(key, 20)

    B = 256
    ffx = jnp.stack(
        [jax.random.randint(ks[i], (B,), 0, FIELD_DIMS[i], dtype=jnp.int32)
         for i in range(F)],
        axis=1,
    )

    V2 = FIELD_DIMS[0] + FIELD_DIMS[1]

    wlin = 0.05 * jax.random.normal(ks[4], (V, 1), jnp.float32)
    blin = 0.1 * jax.random.normal(ks[5], (1, 1), jnp.float32)
    tffm = 0.1 * jax.random.normal(ks[6], (F, V, FFM_EMBED_DIM), jnp.float32)
    tdcn = 0.1 * jax.random.normal(ks[7], (V2, DCN_EMBED_DIM), jnp.float32)

    cw = 0.1 * jax.random.normal(ks[8], (EMBED_OUT, NUM_CROSS_LAYERS), jnp.float32)
    cb = 0.05 * jax.random.normal(ks[9], (NUM_CROSS_LAYERS, EMBED_OUT), jnp.float32)

    w1 = 0.1 * jax.random.normal(ks[10], (EMBED_OUT, MLP_HIDDEN), jnp.float32)
    b1 = 0.05 * jax.random.normal(ks[11], (1, MLP_HIDDEN), jnp.float32)

    bn_gamma = 1.0 + 0.05 * jax.random.normal(ks[12], (1, MLP_HIDDEN), jnp.float32)
    bn_beta = 0.05 * jax.random.normal(ks[13], (1, MLP_HIDDEN), jnp.float32)
    bn_mean = 0.05 * jax.random.normal(ks[14], (1, MLP_HIDDEN), jnp.float32)
    bn_var = 1.0 + 0.1 * jax.random.uniform(ks[15], (1, MLP_HIDDEN), jnp.float32)
    bn = jnp.concatenate([bn_gamma, bn_beta, bn_mean, bn_var], axis=0)

    wcd = 0.1 * jax.random.normal(ks[16], (EMBED_OUT + MLP_HIDDEN, 1), jnp.float32)
    wfin = jax.random.normal(ks[17], (2, 1), jnp.float32)

    params = (wlin, blin, tffm, tdcn, cw, cb, w1, b1, bn, wcd, wfin)

    out = jax.block_until_ready(ffdcn_forward(ffx, params))
    ref = ref_forward(ffx, params)

    assert out.shape == (B,)
    assert jnp.allclose(out, ref, rtol=2e-3, atol=1e-4), (
        float(jnp.max(jnp.abs(out - ref))), out[:4], ref[:4])

    print("KERNEL_OK")
</pallas_src>

<mosaic_0001>
module attributes {stable_mosaic.version = 11 : i64} {
  func.func @_ffdcn_kernel(%arg0: i32, %arg1: memref<128x4xi32, #tpu.memory_space<vmem>>, %arg2: memref<128x128xf32, #tpu.memory_space<vmem>>, %arg3: memref<128x32xf32, #tpu.memory_space<vmem>>, %arg4: memref<1x1xf32, #tpu.memory_space<vmem>>, %arg5: memref<32x3xf32, #tpu.memory_space<vmem>>, %arg6: memref<3x32xf32, #tpu.memory_space<vmem>>, %arg7: memref<32x32xf32, #tpu.memory_space<vmem>>, %arg8: memref<1x32xf32, #tpu.memory_space<vmem>>, %arg9: memref<4x32xf32, #tpu.memory_space<vmem>>, %arg10: memref<64x1xf32, #tpu.memory_space<vmem>>, %arg11: memref<2x1xf32, #tpu.memory_space<vmem>>, %arg12: memref<128x1xf32, #tpu.memory_space<vmem>>) attributes {dimension_semantics = [#tpu.dimension_semantics<parallel>], iteration_bounds = array<i64: 2>, scalar_prefetch = 0 : i64, scratch_operands = 0 : i64, tpu.core_type = #tpu.core_type<tc>, window_params = [{transform_indices = @transform_0, window_bounds = array<i64: 128, 4>}, {pipeline_mode = #tpu.pipeline_mode<synchronous>, transform_indices = @transform_1, window_bounds = array<i64: 128, 128>}, {pipeline_mode = #tpu.pipeline_mode<synchronous>, transform_indices = @transform_2, window_bounds = array<i64: 128, 32>}, {pipeline_mode = #tpu.pipeline_mode<synchronous>, transform_indices = @transform_3, window_bounds = array<i64: 1, 1>}, {pipeline_mode = #tpu.pipeline_mode<synchronous>, transform_indices = @transform_4, window_bounds = array<i64: 32, 3>}, {pipeline_mode = #tpu.pipeline_mode<synchronous>, transform_indices = @transform_5, window_bounds = array<i64: 3, 32>}, {pipeline_mode = #tpu.pipeline_mode<synchronous>, transform_indices = @transform_6, window_bounds = array<i64: 32, 32>}, {pipeline_mode = #tpu.pipeline_mode<synchronous>, transform_indices = @transform_7, window_bounds = array<i64: 1, 32>}, {pipeline_mode = #tpu.pipeline_mode<synchronous>, transform_indices = @transform_8, window_bounds = array<i64: 4, 32>}, {pipeline_mode = #tpu.pipeline_mode<synchronous>, transform_indices = @transform_9, window_bounds = array<i64: 64, 1>}, {pipeline_mode = #tpu.pipeline_mode<synchronous>, transform_indices = @transform_10, window_bounds = array<i64: 2, 1>}, {transform_indices = @transform_11, window_bounds = array<i64: 128, 1>}]} {
    %c0 = arith.constant 0 : index
    %c0_0 = arith.constant 0 : index
    %0 = vector.load %arg1[%c0, %c0_0] : memref<128x4xi32, #tpu.memory_space<vmem>>, vector<128x4xi32>
    %1 = tpu.iota {dimensions = array<i32: 1>} : vector<128x128xi32>
    %2 = vector.extract_strided_slice %0 {offsets = [0, 0], sizes = [128, 1], strides = [1, 1]} : vector<128x4xi32> to vector<128x1xi32>
    %3 = vector.broadcast %2 : vector<128x1xi32> to vector<128x128xi32>
    %4 = arith.cmpi eq, %3, %1 : vector<128x128xi32>
    %5 = arith.extui %4 : vector<128x128xi1> to vector<128x128xi32>
    %6 = arith.sitofp %5 : vector<128x128xi32> to vector<128x128xf32>
    %7 = vector.extract_strided_slice %0 {offsets = [0, 1], sizes = [128, 1], strides = [1, 1]} : vector<128x4xi32> to vector<128x1xi32>
    %8 = vector.broadcast %7 : vector<128x1xi32> to vector<128x128xi32>
    %9 = arith.cmpi eq, %8, %1 : vector<128x128xi32>
    %10 = arith.extui %9 : vector<128x128xi1> to vector<128x128xi32>
    %11 = arith.sitofp %10 : vector<128x128xi32> to vector<128x128xf32>
    %12 = arith.addf %6, %11 : vector<128x128xf32>
    %13 = vector.extract_strided_slice %0 {offsets = [0, 2], sizes = [128, 1], strides = [1, 1]} : vector<128x4xi32> to vector<128x1xi32>
    %14 = vector.broadcast %13 : vector<128x1xi32> to vector<128x128xi32>
    %15 = arith.cmpi eq, %14, %1 : vector<128x128xi32>
    %16 = arith.extui %15 : vector<128x128xi1> to vector<128x128xi32>
    %17 = arith.sitofp %16 : vector<128x128xi32> to vector<128x128xf32>
    %18 = arith.addf %12, %17 : vector<128x128xf32>
    %19 = vector.extract_strided_slice %0 {offsets = [0, 3], sizes = [128, 1], strides = [1, 1]} : vector<128x4xi32> to vector<128x1xi32>
    %20 = vector.broadcast %19 : vector<128x1xi32> to vector<128x128xi32>
    %21 = arith.cmpi eq, %20, %1 : vector<128x128xi32>
    %22 = arith.extui %21 : vector<128x128xi1> to vector<128x128xi32>
    %23 = arith.sitofp %22 : vector<128x128xi32> to vector<128x128xf32>
    %24 = arith.addf %18, %23 : vector<128x128xf32>
    %c0_1 = arith.constant 0 : index
    %c0_2 = arith.constant 0 : index
    %25 = vector.load %arg2[%c0_1, %c0_2] : memref<128x128xf32, #tpu.memory_space<vmem>>, vector<128x128xf32>
    %cst = arith.constant dense<0.000000e+00> : vector<128x128xf32>
    %26 = tpu.matmul %24, %25, %cst {dimension_numbers = #tpu.dot_dimension_numbers<[1], [0], [0], [1], [0, 0, 1, 1], [], []>} : vector<128x128xf32>, vector<128x128xf32>, vector<128x128xf32> -> vector<128x128xf32>
    %27 = arith.mulf %26, %24 : vector<128x128xf32>
    %cst_3 = arith.constant dense<0.000000e+00> : vector<128xf32>
    %28 = vector.multi_reduction <add>, %27, %cst_3 [1] : vector<128x128xf32> to vector<128xf32>
    %29 = vector.shape_cast %28 : vector<128xf32> to vector<128x1xf32>
    %c0_4 = arith.constant 0 : index
    %c0_5 = arith.constant 0 : index
    %30 = vector.load %arg4[%c0_4, %c0_5] : memref<1x1xf32, #tpu.memory_space<vmem>>, vector<1x1xf32>
    %31 = vector.broadcast %30 : vector<1x1xf32> to vector<128x1xf32>
    %32 = arith.addf %29, %31 : vector<128x1xf32>
    %c0_6 = arith.constant 0 : index
    %c0_7 = arith.constant 0 : index
    %33 = vector.load %arg3[%c0_6, %c0_7] : memref<128x32xf32, #tpu.memory_space<vmem>>, vector<128x32xf32>
    %cst_8 = arith.constant dense<0.000000e+00> : vector<128x32xf32>
    %34 = tpu.matmul %24, %33, %cst_8 {dimension_numbers = #tpu.dot_dimension_numbers<[1], [0], [0], [1], [0, 0, 1, 1], [], []>} : vector<128x128xf32>, vector<128x32xf32>, vector<128x32xf32> -> vector<128x32xf32>
    %c0_9 = arith.constant 0 : index
    %c0_10 = arith.constant 0 : index
    %35 = vector.load %arg5[%c0_9, %c0_10] : memref<32x3xf32, #tpu.memory_space<vmem>>, vector<32x3xf32>
    %c0_11 = arith.constant 0 : index
    %c0_12 = arith.constant 0 : index
    %36 = vector.load %arg6[%c0_11, %c0_12] : memref<3x32xf32, #tpu.memory_space<vmem>>, vector<3x32xf32>
    %37 = vector.extract_strided_slice %35 {offsets = [0, 0], sizes = [32, 1], strides = [1, 1]} : vector<32x3xf32> to vector<32x1xf32>
    %cst_13 = arith.constant dense<0.000000e+00> : vector<128x1xf32>
    %38 = tpu.matmul %34, %37, %cst_13 {dimension_numbers = #tpu.dot_dimension_numbers<[1], [0], [0], [1], [0, 0, 1, 1], [], []>} : vector<128x32xf32>, vector<32x1xf32>, vector<128x1xf32> -> vector<128x1xf32>
    %39 = vector.broadcast %38 : vector<128x1xf32> to vector<128x32xf32>
    %40 = arith.mulf %34, %39 : vector<128x32xf32>
    %41 = vector.extract_strided_slice %36 {offsets = [0, 0], sizes = [1, 32], strides = [1, 1]} : vector<3x32xf32> to vector<1x32xf32>
    %42 = vector.broadcast %41 : vector<1x32xf32> to vector<128x32xf32>
    %43 = arith.addf %40, %42 : vector<128x32xf32>
    %44 = arith.addf %43, %34 : vector<128x32xf32>
    %45 = vector.extract_strided_slice %35 {offsets = [0, 1], sizes = [32, 1], strides = [1, 1]} : vector<32x3xf32> to vector<32x1xf32>
    %cst_14 = arith.constant dense<0.000000e+00> : vector<128x1xf32>
    %46 = tpu.matmul %44, %45, %cst_14 {dimension_numbers = #tpu.dot_dimension_numbers<[1], [0], [0], [1], [0, 0, 1, 1], [], []>} : vector<128x32xf32>, vector<32x1xf32>, vector<128x1xf32> -> vector<128x1xf32>
    %47 = vector.broadcast %46 : vector<128x1xf32> to vector<128x32xf32>
    %48 = arith.mulf %34, %47 : vector<128x32xf32>
    %49 = vector.extract_strided_slice %36 {offsets = [1, 0], sizes = [1, 32], strides = [1, 1]} : vector<3x32xf32> to vector<1x32xf32>
    %50 = vector.broadcast %49 : vector<1x32xf32> to vector<128x32xf32>
    %51 = arith.addf %48, %50 : vector<128x32xf32>
    %52 = arith.addf %51, %44 : vector<128x32xf32>
    %53 = vector.extract_strided_slice %35 {offsets = [0, 2], sizes = [32, 1], strides = [1, 1]} : vector<32x3xf32> to vector<32x1xf32>
    %cst_15 = arith.constant dense<0.000000e+00> : vector<128x1xf32>
    %54 = tpu.matmul %52, %53, %cst_15 {dimension_numbers = #tpu.dot_dimension_numbers<[1], [0], [0], [1], [0, 0, 1, 1], [], []>} : vector<128x32xf32>, vector<32x1xf32>, vector<128x1xf32> -> vector<128x1xf32>
    %55 = vector.broadcast %54 : vector<128x1xf32> to vector<128x32xf32>
    %56 = arith.mulf %34, %55 : vector<128x32xf32>
    %57 = vector.extract_strided_slice %36 {offsets = [2, 0], sizes = [1, 32], strides = [1, 1]} : vector<3x32xf32> to vector<1x32xf32>
    %58 = vector.broadcast %57 : vector<1x32xf32> to vector<128x32xf32>
    %59 = arith.addf %56, %58 : vector<128x32xf32>
    %60 = arith.addf %59, %52 : vector<128x32xf32>
    %c0_16 = arith.constant 0 : index
    %c0_17 = arith.constant 0 : index
    %61 = vector.load %arg7[%c0_16, %c0_17] : memref<32x32xf32, #tpu.memory_space<vmem>>, vector<32x32xf32>
    %cst_18 = arith.constant dense<0.000000e+00> : vector<128x32xf32>
    %62 = tpu.matmul %34, %61, %cst_18 {dimension_numbers = #tpu.dot_dimension_numbers<[1], [0], [0], [1], [0, 0, 1, 1], [], []>} : vector<128x32xf32>, vector<32x32xf32>, vector<128x32xf32> -> vector<128x32xf32>
    %c0_19 = arith.constant 0 : index
    %c0_20 = arith.constant 0 : index
    %63 = vector.load %arg8[%c0_19, %c0_20] : memref<1x32xf32, #tpu.memory_space<vmem>>, vector<1x32xf32>
    %64 = vector.broadcast %63 : vector<1x32xf32> to vector<128x32xf32>
    %65 = arith.addf %62, %64 : vector<128x32xf32>
    %c0_21 = arith.constant 0 : index
    %c0_22 = arith.constant 0 : index
    %66 = vector.load %arg9[%c0_21, %c0_22] : memref<4x32xf32, #tpu.memory_space<vmem>>, vector<4x32xf32>
    %67 = vector.extract_strided_slice %66 {offsets = [0, 0], sizes = [1, 32], strides = [1, 1]} : vector<4x32xf32> to vector<1x32xf32>
    %68 = vector.extract_strided_slice %66 {offsets = [1, 0], sizes = [1, 32], strides = [1, 1]} : vector<4x32xf32> to vector<1x32xf32>
    %69 = vector.extract_strided_slice %66 {offsets = [2, 0], sizes = [1, 32], strides = [1, 1]} : vector<4x32xf32> to vector<1x32xf32>
    %70 = vector.extract_strided_slice %66 {offsets = [3, 0], sizes = [1, 32], strides = [1, 1]} : vector<4x32xf32> to vector<1x32xf32>
    %cst_23 = arith.constant 9.99999974E-6 : f32
    %71 = vector.broadcast %cst_23 : f32 to vector<1x32xf32>
    %72 = arith.addf %70, %71 : vector<1x32xf32>
    %73 = math.rsqrt %72 : vector<1x32xf32>
    %74 = arith.mulf %67, %73 : vector<1x32xf32>
    %75 = vector.broadcast %69 : vector<1x32xf32> to vector<128x32xf32>
    %76 = arith.subf %65, %75 : vector<128x32xf32>
    %77 = vector.broadcast %74 : vector<1x32xf32> to vector<128x32xf32>
    %78 = arith.mulf %76, %77 : vector<128x32xf32>
    %79 = vector.broadcast %68 : vector<1x32xf32> to vector<128x32xf32>
    %80 = arith.addf %78, %79 : vector<128x32xf32>
    %cst_24 = arith.constant 0.000000e+00 : f32
    %81 = vector.broadcast %cst_24 : f32 to vector<128x32xf32>
    %82 = arith.maximumf %80, %81 : vector<128x32xf32>
    %c0_25 = arith.constant 0 : index
    %c0_26 = arith.constant 0 : index
    %83 = vector.load %arg10[%c0_25, %c0_26] : memref<64x1xf32, #tpu.memory_space<vmem>>, vector<64x1xf32>
    %84 = vector.extract_strided_slice %83 {offsets = [0, 0], sizes = [32, 1], strides = [1, 1]} : vector<64x1xf32> to vector<32x1xf32>
    %cst_27 = arith.constant dense<0.000000e+00> : vector<128x1xf32>
    %85 = tpu.matmul %60, %84, %cst_27 {dimension_numbers = #tpu.dot_dimension_numbers<[1], [0], [0], [1], [0, 0, 1, 1], [], []>} : vector<128x32xf32>, vector<32x1xf32>, vector<128x1xf32> -> vector<128x1xf32>
    %86 = vector.extract_strided_slice %83 {offsets = [32, 0], sizes = [32, 1], strides = [1, 1]} : vector<64x1xf32> to vector<32x1xf32>
    %cst_28 = arith.constant dense<0.000000e+00> : vector<128x1xf32>
    %87 = tpu.matmul %82, %86, %cst_28 {dimension_numbers = #tpu.dot_dimension_numbers<[1], [0], [0], [1], [0, 0, 1, 1], [], []>} : vector<128x32xf32>, vector<32x1xf32>, vector<128x1xf32> -> vector<128x1xf32>
    %88 = arith.addf %85, %87 : vector<128x1xf32>
    %c0_29 = arith.constant 0 : index
    %c0_30 = arith.constant 0 : index
    %89 = vector.load %arg11[%c0_29, %c0_30] : memref<2x1xf32, #tpu.memory_space<vmem>>, vector<2x1xf32>
    %90 = vector.extract_strided_slice %89 {offsets = [0, 0], sizes = [1, 1], strides = [1, 1]} : vector<2x1xf32> to vector<1x1xf32>
    %91 = vector.broadcast %90 : vector<1x1xf32> to vector<128x1xf32>
    %92 = arith.mulf %32, %91 : vector<128x1xf32>
    %93 = vector.extract_strided_slice %89 {offsets = [1, 0], sizes = [1, 1], strides = [1, 1]} : vector<2x1xf32> to vector<1x1xf32>
    %94 = vector.broadcast %93 : vector<1x1xf32> to vector<128x1xf32>
    %95 = arith.mulf %88, %94 : vector<128x1xf32>
    %96 = arith.addf %92, %95 : vector<128x1xf32>
    %c0_31 = arith.constant 0 : index
    %c0_32 = arith.constant 0 : index
    %97 = vector.load %arg12[%c0_31, %c0_32] : memref<128x1xf32, #tpu.memory_space<vmem>>, vector<128x1xf32>
    tpu.vector_store %arg12[%c0_31, %c0_32], %96 {strides = array<i32>} : memref<128x1xf32, #tpu.memory_space<vmem>>, vector<128x1xf32>,
    return
  }
  func.func @transform_0(%arg0: i32) -> (i32, i32) {
    %c0_i32 = arith.constant 0 : i32
    %c0_i32_0 = arith.constant 0 : i32
    return %arg0, %c0_i32 : i32, i32
  }
  func.func @transform_1(%arg0: i32) -> (i32, i32) {
    %c0_i32 = arith.constant 0 : i32
    %c0_i32_0 = arith.constant 0 : i32
    %c0_i32_1 = arith.constant 0 : i32
    return %c0_i32, %c0_i32_0 : i32, i32
  }
  func.func @transform_2(%arg0: i32) -> (i32, i32) {
    %c0_i32 = arith.constant 0 : i32
    %c0_i32_0 = arith.constant 0 : i32
    %c0_i32_1 = arith.constant 0 : i32
    return %c0_i32, %c0_i32_0 : i32, i32
  }
  func.func @transform_3(%arg0: i32) -> (i32, i32) {
    %c0_i32 = arith.constant 0 : i32
    %c0_i32_0 = arith.constant 0 : i32
    %c0_i32_1 = arith.constant 0 : i32
    return %c0_i32, %c0_i32_0 : i32, i32
  }
  func.func @transform_4(%arg0: i32) -> (i32, i32) {
    %c0_i32 = arith.constant 0 : i32
    %c0_i32_0 = arith.constant 0 : i32
    %c0_i32_1 = arith.constant 0 : i32
    return %c0_i32, %c0_i32_0 : i32, i32
  }
  func.func @transform_5(%arg0: i32) -> (i32, i32) {
    %c0_i32 = arith.constant 0 : i32
    %c0_i32_0 = arith.constant 0 : i32
    %c0_i32_1 = arith.constant 0 : i32
    return %c0_i32, %c0_i32_0 : i32, i32
  }
  func.func @transform_6(%arg0: i32) -> (i32, i32) {
    %c0_i32 = arith.constant 0 : i32
    %c0_i32_0 = arith.constant 0 : i32
    %c0_i32_1 = arith.constant 0 : i32
    return %c0_i32, %c0_i32_0 : i32, i32
  }
  func.func @transform_7(%arg0: i32) -> (i32, i32) {
    %c0_i32 = arith.constant 0 : i32
    %c0_i32_0 = arith.constant 0 : i32
    %c0_i32_1 = arith.constant 0 : i32
    return %c0_i32, %c0_i32_0 : i32, i32
  }
  func.func @transform_8(%arg0: i32) -> (i32, i32) {
    %c0_i32 = arith.constant 0 : i32
    %c0_i32_0 = arith.constant 0 : i32
    %c0_i32_1 = arith.constant 0 : i32
    return %c0_i32, %c0_i32_0 : i32, i32
  }
  func.func @transform_9(%arg0: i32) -> (i32, i32) {
    %c0_i32 = arith.constant 0 : i32
    %c0_i32_0 = arith.constant 0 : i32
    %c0_i32_1 = arith.constant 0 : i32
    return %c0_i32, %c0_i32_0 : i32, i32
  }
  func.func @transform_10(%arg0: i32) -> (i32, i32) {
    %c0_i32 = arith.constant 0 : i32
    %c0_i32_0 = arith.constant 0 : i32
    %c0_i32_1 = arith.constant 0 : i32
    return %c0_i32, %c0_i32_0 : i32, i32
  }
  func.func @transform_11(%arg0: i32) -> (i32, i32) {
    %c0_i32 = arith.constant 0 : i32
    %c0_i32_0 = arith.constant 0 : i32
    return %arg0, %c0_i32 : i32, i32
  }
}

</mosaic_0001>

<bundles_post_ra>
// kernel: tpu_custom_call.1
= control target key start
LH: loop header
LB: loop body
LE: loop exit
PB: predicated region body
PF: predicated region fallthrough
CT: control target
= control target key end

     0   :  { %s3960_s19 = smov 0   ;;  %s5255_s0 = inlined_call_operand.vmem [shape: s32[256,4], index: 0, kind: input, shape index: {}]   ;;  %s5256_s1 = inlined_call_operand.vmem [shape: f32[128,128], index: 1, kind: input, shape index: {}]   ;;  %s5257_s2 = inlined_call_operand.vmem [shape: f32[128,32], index: 2, kind: input, shape index: {}]   ;;  %s5258_s3 = inlined_call_operand.<no memory space> [shape: f32[1,1], index: 3, kind: input, shape index: {}]   ;;  %s5259_s4 = inlined_call_operand.vmem [shape: f32[32,3], index: 4, kind: input, shape index: {}]   ;;  %s5260_s5 = inlined_call_operand.vmem [shape: f32[3,32], index: 5, kind: input, shape index: {}]   ;;  %s5261_s6 = inlined_call_operand.vmem [shape: f32[32,32], index: 6, kind: input, shape index: {}]   ;;  %s5262_s7 = inlined_call_operand.vmem [shape: f32[1,32], index: 7, kind: input, shape index: {}]   ;;  %s5263_s8 = inlined_call_operand.vmem [shape: f32[4,32], index: 8, kind: input, shape index: {}]   ;;  %s5264_s9 = inlined_call_operand.vmem [shape: f32[64,1], index: 9, kind: input, shape index: {}]   ;;  %s5265_s10 = inlined_call_operand.vmem [shape: f32[2,1], index: 10, kind: input, shape index: {}]   ;;  %s5266_s11 = inlined_call_operand.vmem [shape: f32[256,1], index: 11, kind: output, shape index: {}]  }
   0x1   :  { %v16_v0 = vstv %s5258_s3 }
   0x2   :  { %17 = vst [vmem:[#allocation2] sm:$0x1] %v16_v0 }
   0x3 LB: > { %s3007_s20 = sadd.s32 4294967295, %s3888_s19   ;;  %p3011_p0 = scmp.ge.s32.totalorder %s3888_s19, 1  ;;  %s3888_s19 = sphi %s3960_s19, %s23_s19  }
   0x4   : > { %p340_p1 = scmp.lt.s32.totalorder %s3888_s19, 3 }
   0x6   : > { %p341_p2 = pnand %p3011_p0, %p340_p1 }
   0x8   : > { %344 = sbr.rel (%p341_p2) target bundleno = 1881 (0x759), region = 64 }
   0xf   : > { %s3012_s21 = sshll.u32 %s3007_s20, 4  ;;  %v3890_v1 = vmov 0   ;;  %v3891_v4 = vmov 1   ;;  %v3892_v5 = vmov 2   ;;  %v3893_v6 = vmov 3   ;;  %v842_v13 = vld [vmem:[%s5256_s1] sm:$0xff] }
  0x10   : > { %3817 = vset.pattern.permute.xlu1 %v3890_v1  ;;  %3815 = vset.pattern.permute.xlu0 %v3890_v1  ;;  %p381_p3 = scmp.lt.s32.totalorder %s3012_s21, 31  ;;  %v843_v14 = vld [vmem:[%s5256_s1 + $0x8] sm:$0xff]  ;;  %v844_v17 = vld [vmem:[%s5256_s1 + $0x10] sm:$0xff]  ;;  %v845_v18 = vld [vmem:[%s5256_s1 + $0x18] sm:$0xff]  ;;  %v408_v44 = vlaneseq  ;;  %v3894_v50 = vmov 0.0   ;;  %s3895_s30 = smov 127  }
  0x11   : > { %v3668_v16 = vpack.c.bf16 %v843_v14, %v842_v13  ;;  %v3672_v20 = vpack.c.bf16 %v845_v18, %v844_v17  ;;  %v846_v21 = vld [vmem:[%s5256_s1 + $0x20] sm:$0xff]  ;;  %v847_v22 = vld [vmem:[%s5256_s1 + $0x28] sm:$0xff]  ;;  %v848_v25 = vld [vmem:[%s5256_s1 + $0x30] sm:$0xff]  ;;  %s3896_s12 = smov 126  }
  0x12   : > { %s5373_s21 = smov (!%p381_p3, %s3012_s21), 31  ;;  %v3676_v24 = vpack.c.bf16 %v847_v22, %v846_v21  ;;  %v849_v26 = vld [vmem:[%s5256_s1 + $0x38] sm:$0xff]  ;;  %v850_v29 = vld [vmem:[%s5256_s1 + $0x40] sm:$0xff]  ;;  %v851_v30 = vld [vmem:[%s5256_s1 + $0x48] sm:$0xff]  ;;  %v4137_v47 = vand.u32 127, %v408_v44 }
  0x13   : > { %s3013_s3 = sshll.u32 %s5373_s21, 3  ;;  %3669 = vmatprep.subr.bf16.mxu1 %v3668_v16  ;;  %v3680_v28 = vpack.c.bf16 %v849_v26, %v848_v25  ;;  %v3684_v32 = vpack.c.bf16 %v851_v30, %v850_v29  ;;  %v852_v33 = vld [vmem:[%s5256_s1 + $0x50] sm:$0xff]  ;;  %v853_v34 = vld [vmem:[%s5256_s1 + $0x58] sm:$0xff]  ;;  %v854_v37 = vld [vmem:[%s5256_s1 + $0x60] sm:$0xff] }
  0x14   : > { %s3978_s24 = scalar_lea.vmem %s5255_s0, %s3013_s3  ;;  %3671 = vmatpush3.bf16.msra.mxu1 %v3668_v16  ;;  %v3688_v36 = vpack.c.bf16 %v853_v34, %v852_v33  ;;  %v855_v38 = vld [vmem:[%s5256_s1 + $0x68] sm:$0xff]  ;;  %v856_v40 = vld [vmem:[%s5256_s1 + $0x70] sm:$0xff]  ;;  %v857_v41 = vld [vmem:[%s5256_s1 + $0x78] sm:$0xff]  ;;  %s5175_s13 = scalar_lea.vmem %s5266_s11, %s3013_s3 }
  0x15   : > { %v3981_v2 = vld [vmem:[%s3978_s24 + $0x8] sm:$0xff]  ;;  %v392_v3 = vld [vmem:[%s3978_s24] sm:$0xff]  ;;  %v394_v7 = vld [vmem:[%s3978_s24 + $0x10] sm:$0xff]  ;;  %3673 = vmatprep.subr.bf16.mxu1 %v3672_v20  ;;  %v3692_v39 = vpack.c.bf16 %v855_v38, %v854_v37  ;;  %v3696_v42 = vpack.c.bf16 %v857_v41, %v856_v40 }
  0x16   : > { %414 = vperm.xlu1 %3817, %v3981_v2   ;;  %411 = vperm.xlu0 %3815, %v392_v3   ;;  %v3995_v8 = vld [vmem:[%s3978_s24 + $0x18] sm:$0xff]  ;;  %v396_v9 = vld [vmem:[%s3978_s24 + $0x20] sm:$0xff]  ;;  %v4002_v10 = vld [vmem:[%s3978_s24 + $0x28] sm:$0xff] }
  0x17   : > { %v4008_v11 = vld [vmem:[%s3978_s24 + $0x30] sm:$0xff]  ;;  %v4013_v12 = vld [vmem:[%s3978_s24 + $0x38] sm:$0xff]  ;;  %v4024_v15 = vld [vmem:[%s3978_s24 + $0x40] sm:$0xff] }
  0x18   : > { %v4034_v19 = vld [vmem:[%s3978_s24 + $0x48] sm:$0xff]  ;;  %3675 = vmatpush3.bf16.msra.mxu1 %v3672_v20  ;;  %v4045_v23 = vld [vmem:[%s3978_s24 + $0x50] sm:$0xff]  ;;  %v4057_v27 = vld [vmem:[%s3978_s24 + $0x58] sm:$0xff] }
  0x19   : > { %3677 = vmatprep.subr.bf16.mxu1 %v3676_v24  ;;  %v4069_v31 = vld [vmem:[%s3978_s24 + $0x60] sm:$0xff]  ;;  %v4080_v35 = vld [vmem:[%s3978_s24 + $0x68] sm:$0xff]  ;;  %v4116_v43 = vld [vmem:[%s3978_s24 + $0x78] sm:$0xff] }
  0x1a   : > { %3818 = vset.pattern.permute.xlu1 %v3891_v4  ;;  %3816 = vset.pattern.permute.xlu0 %v3891_v4  ;;  %v1074_v14 = vld [vmem:[%s5257_s2] sm:$0xff]  ;;  %v1076_v40 = vld [vmem:[%s5257_s2 + $0x10] sm:$0xff]  ;;  %v1077_v41 = vld [vmem:[%s5257_s2 + $0x18] sm:$0xff] }
  0x1b   : > { %510 = vperm.xlu1 %3818, %v3981_v2   ;;  %507 = vperm.xlu0 %3816, %v392_v3  }
  0x1c   : > { %3679 = vmatpush3.bf16.msra.mxu1 %v3676_v24 }
  0x1d   : > { %3681 = vmatprep.subr.bf16.mxu1 %v3680_v28 }
  0x1f   : > { %3819 = vset.pattern.permute.xlu1 %v3892_v5  ;;  %3822 = vset.pattern.permute.xlu0 %v3893_v6 }
  0x20   : > { %619 = vperm.xlu1 %3819, %v392_v3   ;;  %731 = vperm.xlu0 %3822, %v392_v3  }
  0x21   : > { %3683 = vmatpush3.bf16.msra.mxu1 %v3680_v28 }
  0x22   : > { %3685 = vmatprep.subr.bf16.mxu1 %v3684_v32 }
  0x24   : > { %3820 = vset.pattern.permute.xlu1 %v3890_v1  ;;  %734 = vperm.xlu0 %3822, %v3981_v2  }
  0x25   : > { %417 = vperm.xlu1 %3820, %v394_v7   ;;  %3687 = vmatpush3.bf16.msra.mxu1 %v3684_v32 }
  0x26   : > { %3689 = vmatprep.subr.bf16.mxu1 %v3688_v36 }
  0x28   : > { %737 = vperm.xlu0 %3822, %v394_v7  }
  0x29   : > { %3821 = vset.pattern.permute.xlu1 %v3891_v4  ;;  %3691 = vmatpush3.bf16.msra.mxu1 %v3688_v36 }
  0x2a   : > { %513 = vperm.xlu1 %3821, %v394_v7   ;;  %3693 = vmatprep.subr.bf16.mxu1 %v3692_v39 }
  0x2c   : > { %740 = vperm.xlu0 %3822, %v3995_v8  }
  0x2d   : > { %3695 = vmatpush3.bf16.msra.mxu1 %v3692_v39 }
  0x2e   : > { %3823 = vset.pattern.permute.xlu1 %v3890_v1  ;;  %3697 = vmatprep.subr.bf16.mxu1 %v3696_v42 }
  0x2f   : > { %420 = vperm.xlu1 %3823, %v3995_v8  }
  0x30   : > { %743 = vperm.xlu0 %3822, %v396_v9  }
  0x31   : > { %3699 = vmatpush3.bf16.msra.mxu1 %v3696_v42 }
  0x33   : > { %3824 = vset.pattern.permute.xlu1 %v3891_v4 }
  0x34   : > { %516 = vperm.xlu1 %3824, %v3995_v8   ;;  %746 = vperm.xlu0 %3822, %v4002_v10  }
  0x38   : > { %3825 = vset.pattern.permute.xlu1 %v3892_v5  ;;  %749 = vperm.xlu0 %3822, %v4008_v11  }
  0x39   : > { %625 = vperm.xlu1 %3825, %v394_v7  }
  0x3c   : > { %752 = vperm.xlu0 %3822, %v4013_v12  }
  0x3d   : > { %3826 = vset.pattern.permute.xlu1 %v3890_v1 }
  0x3e   : > { %423 = vperm.xlu1 %3826, %v396_v9  }
  0x40   : > { %755 = vperm.xlu0 %3822, %v4024_v15  }
  0x42   : > { %3827 = vset.pattern.permute.xlu1 %v3891_v4 }
  0x43   : > { %519 = vperm.xlu1 %3827, %v396_v9  }
  0x44   : > { %758 = vperm.xlu0 %3822, %v4034_v19  }
  0x47   : > { %3828 = vset.pattern.permute.xlu1 %v3890_v1 }
  0x48   : > { %426 = vperm.xlu1 %3828, %v4002_v10   ;;  %761 = vperm.xlu0 %3822, %v4045_v23  }
  0x4c   : > { %3829 = vset.pattern.permute.xlu1 %v3891_v4  ;;  %764 = vperm.xlu0 %3822, %v4057_v27  }
  0x4d   : > { %522 = vperm.xlu1 %3829, %v4002_v10  }
  0x50   : > { %767 = vperm.xlu0 %3822, %v4069_v31  }
  0x51   : > { %3830 = vset.pattern.permute.xlu1 %v3892_v5 }
  0x52   : > { %631 = vperm.xlu1 %3830, %v396_v9  }
  0x54   : > { %770 = vperm.xlu0 %3822, %v4080_v35  }
  0x56   : > { %3831 = vset.pattern.permute.xlu1 %v3890_v1 }
  0x57   : > { %429 = vperm.xlu1 %3831, %v4008_v11  }
  0x58   : > { %3855 = vset.pattern.permute.xlu0 %v3892_v5 }
  0x59   : > { %622 = vperm.xlu0 %3855, %v3981_v2  }
  0x5b   : > { %3832 = vset.pattern.permute.xlu1 %v3891_v4 }
  0x5c   : > { %525 = vperm.xlu1 %3832, %v4008_v11  }
  0x5d   : > { %628 = vperm.xlu0 %3855, %v3995_v8  }
  0x60   : > { %3833 = vset.pattern.permute.xlu1 %v3890_v1 }
  0x61   : > { %432 = vperm.xlu1 %3833, %v4013_v12   ;;  %634 = vperm.xlu0 %3855, %v4002_v10  }
  0x65   : > { %3834 = vset.pattern.permute.xlu1 %v3891_v4  ;;  %640 = vperm.xlu0 %3855, %v4013_v12  }
  0x66   : > { %528 = vperm.xlu1 %3834, %v4013_v12  }
  0x69   : > { %646 = vperm.xlu0 %3855, %v4034_v19  }
  0x6a   : > { %3835 = vset.pattern.permute.xlu1 %v3892_v5 }
  0x6b   : > { %637 = vperm.xlu1 %3835, %v4008_v11   ;;  %v406_v11 = vld [vmem:[%s3978_s24 + $0x70] sm:$0xff] }
  0x6d   : > { %652 = vperm.xlu0 %3855, %v4057_v27  }
  0x6f   : > { %3836 = vset.pattern.permute.xlu1 %v3890_v1 }
  0x70   : > { %435 = vperm.xlu1 %3836, %v4024_v15  }
  0x71   : > { %658 = vperm.xlu0 %3855, %v4080_v35  }
  0x74   : > { %3837 = vset.pattern.permute.xlu1 %v3891_v4 }
  0x75   : > { %531 = vperm.xlu1 %3837, %v4024_v15   ;;  %664 = vperm.xlu0 %3855, %v4116_v43  }
  0x79   : > { %3838 = vset.pattern.permute.xlu1 %v3890_v1  ;;  %3859 = vset.pattern.permute.xlu0 %v3890_v1 }
  0x7a   : > { %438 = vperm.xlu1 %3838, %v4034_v19  }
  0x7e   : > { %3839 = vset.pattern.permute.xlu1 %v3891_v4 }
  0x7f   : > { %534 = vperm.xlu1 %3839, %v4034_v19  }
  0x83   : > { %3840 = vset.pattern.permute.xlu1 %v3892_v5 }
  0x84   : > { %643 = vperm.xlu1 %3840, %v4024_v15   ;;  %v1075_v15 = vld [vmem:[%s5257_s2 + $0x8] sm:$0xff] }
  0x85   : > { %v4190_v16 = vpack.c.bf16 %v1075_v15, %v1074_v14  ;;  %v1080_v14 = vld [vmem:[%s5257_s2 + $0x30] sm:$0xff]  ;;  %v1081_v15 = vld [vmem:[%s5257_s2 + $0x38] sm:$0xff] }
  0x87   : > { %3701 = vmatprep.subr.bf16.mxu1 %v4190_v16 }
  0x88   : > { %3841 = vset.pattern.permute.xlu1 %v3890_v1 }
  0x89   : > { %441 = vperm.xlu1 %3841, %v4045_v23  }
  0x8d   : > { %3842 = vset.pattern.permute.xlu1 %v3891_v4 }
  0x8e   : > { %537 = vperm.xlu1 %3842, %v4045_v23  }
  0x92   : > { %3843 = vset.pattern.permute.xlu1 %v3890_v1 }
  0x93   : > { %444 = vperm.xlu1 %3843, %v4057_v27  }
  0x95   : > { %v4134_v45 = vpop.permute.xlu1 %414  ;;  %v412_v46 = vpop.permute.xlu0 %411 }
  0x96   : > { %vm458_vm0 = vcmp.eq.s32.totalorder %v412_v46, %v4137_v47  ;;  %vm459_vm5 = vcmp.eq.s32.totalorder %v4134_v45, %v4137_v47 }
  0x97   : > { %3844 = vset.pattern.permute.xlu1 %v3891_v4  ;;  %v3016_v51 = vsel %vm458_vm0, 1.0, %v3894_v50 }
  0x98   : > { %540 = vperm.xlu1 %3844, %v4057_v27  }
  0x9a   : > { %v4142_v48 = vpop.permute.xlu1 %510  ;;  %v508_v49 = vpop.permute.xlu0 %507 }
  0x9b   : > { %vm554_vm1 = vcmp.eq.s32.totalorder %v508_v49, %v4137_v47  ;;  %vm555_vm4 = vcmp.eq.s32.totalorder %v4142_v48, %v4137_v47 }
  0x9c   : > { %3845 = vset.pattern.permute.xlu1 %v3892_v5  ;;  %v3032_v52 = vsel %vm554_vm1, 1.0, %v3894_v50 }
  0x9d   : > { %649 = vperm.xlu1 %3845, %v4045_v23   ;;  %v602_v53 = vadd.f32 %v3032_v52, %v3016_v51 }
  0x9f   : > { %v620_v54 = vpop.permute.xlu1 %619  ;;  %v732_v55 = vpop.permute.xlu0 %731 }
  0xa0   : > { %vm666_vm2 = vcmp.eq.s32.totalorder %v620_v54, %v4137_v47  ;;  %vm778_vm3 = vcmp.eq.s32.totalorder %v732_v55, %v4137_v47  ;;  %v3704_v54 = vpack.c.bf16 %v1077_v41, %v1076_v40  ;;  %v1086_v41 = vld [vmem:[%s5257_s2 + $0x60] sm:$0xff] }
  0xa1   : > { %v3048_v56 = vsel %vm666_vm2, 1.0, %v3894_v50  ;;  %v3064_v57 = vsel %vm778_vm3, 1.0, %v3894_v50  ;;  %3846 = vset.pattern.permute.xlu1 %v3890_v1 }
  0xa2   : > { %v714_v58 = vadd.f32 %v3048_v56, %v602_v53  ;;  %447 = vperm.xlu1 %3846, %v4069_v31  }
  0xa3   : > { %v4155_v59 = vpop.permute.xlu0 %734 }
  0xa4   : > { %v4157_v60 = vadd.f32 %v3064_v57, %v714_v58  ;;  %v418_v61 = vpop.permute.xlu1 %417  ;;  %vm779_vm9 = vcmp.eq.s32.totalorder %v4155_v59, %v4137_v47  ;;  %v1078_v59 = vld [vmem:[%s5257_s2 + $0x20] sm:$0xff] }
  0xa5   : > { %vm460_vm7 = vcmp.eq.s32.totalorder %v418_v61, %v4137_v47 }
  0xa6   : > { %5288 = vst [vmem:[#allocation3_spill] sm:$0xff] %v4157_v60  ;;  %3847 = vset.pattern.permute.xlu1 %v3891_v4  ;;  %3396 = vmatprep.mubr.f32.mxu1 %v4157_v60  ;;  %v3018_v29 = vsel %vm460_vm7, 1.0, %v3894_v50 }
  0xa7   : > { %543 = vperm.xlu1 %3847, %v4069_v31   ;;  %v4162_v62 = vpop.permute.xlu0 %737 }
  0xa8   : > { %vm780_vm12 = vcmp.eq.s32.totalorder %v4162_v62, %v4137_v47 }
  0xa9   : > { %v514_v63 = vpop.permute.xlu1 %513  ;;  %v3066_v36 = vsel %vm780_vm12, 1.0, %v3894_v50 }
  0xaa   : > { %vm556_vm6 = vcmp.eq.s32.totalorder %v514_v63, %v4137_v47 }
  0xab   : > { %3848 = vset.pattern.permute.xlu1 %v3890_v1  ;;  %v4165_v0 = vpop.permute.xlu0 %740  ;;  %v3034_v27 = vsel %vm556_vm6, 1.0, %v3894_v50 }
  0xac   : > { %450 = vperm.xlu1 %3848, %v4080_v35   ;;  %v604_v32 = vadd.f32 %v3034_v27, %v3018_v29  ;;  %vm781_vm0 = vcmp.eq.s32.totalorder %v4165_v0, %v4137_v47 }
  0xad   : > { %v3067_v48 = vsel %vm781_vm0, 1.0, %v3894_v50 }
  0xae   : > { %v4168_v2 = vpop.permute.xlu1 %420 }
  0xaf   : > { %v4170_v3 = vpop.permute.xlu0 %743  ;;  %vm461_vm13 = vcmp.eq.s32.totalorder %v4168_v2, %v4137_v47 }
  0xb0   : > { %3849 = vset.pattern.permute.xlu1 %v3891_v4  ;;  %v3019_v37 = vsel %vm461_vm13, 1.0, %v3894_v50  ;;  %vm782_vm3 = vcmp.eq.s32.totalorder %v4170_v3, %v4137_v47 }
  0xb1   : > { %546 = vperm.xlu1 %3849, %v4080_v35   ;;  %v3068_v61 = vsel %vm782_vm3, 1.0, %v3894_v50 }
  0xb3   : > { %v517_v7 = vpop.permute.xlu1 %516  ;;  %v4174_v8 = vpop.permute.xlu0 %746 }
  0xb4   : > { %vm557_vm10 = vcmp.eq.s32.totalorder %v517_v7, %v4137_v47  ;;  %vm783_vm6 = vcmp.eq.s32.totalorder %v4174_v8, %v4137_v47 }
  0xb5   : > { %3850 = vset.pattern.permute.xlu1 %v3892_v5  ;;  %v3035_v34 = vsel %vm557_vm10, 1.0, %v3894_v50  ;;  %v3069_v8 = vsel %vm783_vm6, 1.0, %v3894_v50 }
  0xb6   : > { %655 = vperm.xlu1 %3850, %v4069_v31   ;;  %v3065_v31 = vsel %vm779_vm9, 1.0, %v3894_v50  ;;  %v605_v49 = vadd.f32 %v3035_v34, %v3019_v37  ;;  %v1084_v34 = vld [vmem:[%s5257_s2 + $0x50] sm:$0xff] }
  0xb7   : > { %v4178_v9 = vpop.permute.xlu0 %749 }
  0xb8   : > { %v626_v10 = vpop.permute.xlu1 %625  ;;  %vm784_vm13 = vcmp.eq.s32.totalorder %v4178_v9, %v4137_v47 }
  0xb9   : > { %vm668_vm8 = vcmp.eq.s32.totalorder %v626_v10, %v4137_v47  ;;  %v3070_v9 = vsel %vm784_vm13, 1.0, %v3894_v50 }
  0xba   : > { %3851 = vset.pattern.permute.xlu1 %v3890_v1  ;;  %v3050_v30 = vsel %vm668_vm8, 1.0, %v3894_v50 }
  0xbb   : > { %453 = vperm.xlu1 %3851, %v406_v11   ;;  %v4182_v12 = vpop.permute.xlu0 %752  ;;  %v716_v38 = vadd.f32 %v3050_v30, %v604_v32 }
  0xbd   : > { %v424_v13 = vpop.permute.xlu1 %423  ;;  %v4268_v58 = vadd.f32 %v3066_v36, %v716_v38 }
  0xbe   : > { %vm462_vm14 = vcmp.eq.s32.totalorder %v424_v13, %v4137_v47 }
  0xbf   : > { %3852 = vset.pattern.permute.xlu1 %v3891_v4  ;;  %v4193_v17 = vpop.permute.xlu0 %755  ;;  %v3020_v42 = vsel %vm462_vm14, 1.0, %v3894_v50  ;;  %5290 = vst [vmem:[#allocation5_spill] sm:$0xff] %v4268_v58  ;;  %vm785_vm14 = vcmp.eq.s32.totalorder %v4182_v12, %v4137_v47 }
  0xc0   : > { %549 = vperm.xlu1 %3852, %v406_v11   ;;  %v3071_v12 = vsel %vm785_vm14, 1.0, %v3894_v50 }
  0xc2   : > { %v520_v18 = vpop.permute.xlu1 %519 }
  0xc3   : > { %v4196_v19 = vpop.permute.xlu0 %758  ;;  %vm558_vm11 = vcmp.eq.s32.totalorder %v520_v18, %v4137_v47 }
  0xc4   : > { %3853 = vset.pattern.permute.xlu1 %v3890_v1  ;;  %v3036_v35 = vsel %vm558_vm11, 1.0, %v3894_v50 }
  0xc5   : > { %456 = vperm.xlu1 %3853, %v4116_v43   ;;  %v606_v51 = vadd.f32 %v3036_v35, %v3020_v42  ;;  %v1085_v35 = vld [vmem:[%s5257_s2 + $0x58] sm:$0xff]  ;;  %v1087_v42 = vld [vmem:[%s5257_s2 + $0x68] sm:$0xff] }
  0xc6   : > { %v3720_v40 = vpack.c.bf16 %v1085_v35, %v1084_v34 }
  0xc7   : > { %v4200_v20 = vpop.permute.xlu1 %426  ;;  %v4202_v21 = vpop.permute.xlu0 %761 }
  0xc8   : > { %vm788_vm13 = vcmp.eq.s32.totalorder %v4202_v21, %v4137_v47 }
  0xc9   : > { %3854 = vset.pattern.permute.xlu1 %v3891_v4  ;;  %v3033_v4 = vsel %vm555_vm4, 1.0, %v3894_v50  ;;  %vm463_vm4 = vcmp.eq.s32.totalorder %v4200_v20, %v4137_v47 }
  0xca   : > { %552 = vperm.xlu1 %3854, %v4116_v43   ;;  %v3021_v63 = vsel %vm463_vm4, 1.0, %v3894_v50 }
  0xcb   : > { %v4206_v22 = vpop.permute.xlu0 %764 }
  0xcc   : > { %v523_v23 = vpop.permute.xlu1 %522 }
  0xcd   : > { %vm559_vm2 = vcmp.eq.s32.totalorder %v523_v23, %v4137_v47 }
  0xce   : > { %3856 = vset.pattern.permute.xlu1 %v3892_v5  ;;  %v3017_v5 = vsel %vm459_vm5, 1.0, %v3894_v50  ;;  %v3037_v55 = vsel %vm559_vm2, 1.0, %v3894_v50 }
  0xcf   : > { %661 = vperm.xlu1 %3856, %v406_v11   ;;  %v4209_v24 = vpop.permute.xlu0 %767  ;;  %v603_v28 = vadd.f32 %v3033_v4, %v3017_v5  ;;  %v607_v3 = vadd.f32 %v3037_v55, %v3021_v63  ;;  %v1082_v4 = vld [vmem:[%s5257_s2 + $0x40] sm:$0xff]  ;;  %v1083_v5 = vld [vmem:[%s5257_s2 + $0x48] sm:$0xff] }
  0xd0   : > { %v3716_v32 = vpack.c.bf16 %v1083_v5, %v1082_v4 }
  0xd1   : > { %v632_v25 = vpop.permute.xlu1 %631 }
  0xd2   : > { %vm670_vm15 = vcmp.eq.s32.totalorder %v632_v25, %v4137_v47  ;;  %v3712_v25 = vpack.c.bf16 %v1081_v15, %v1080_v14 }
  0xd3   : > { %3857 = vset.pattern.permute.xlu1 %v3893_v6  ;;  %v4218_v26 = vpop.permute.xlu0 %770 }
  0xd4   : > { %773 = vperm.xlu1 %3857, %v406_v11  }
  0xd6   : > { %v4228_v6 = vpop.permute.xlu1 %429 }
  0xd7   : > { %vm464_vm12 = vcmp.eq.s32.totalorder %v4228_v6, %v4137_v47 }
  0xd8   : > { %776 = vperm.xlu1 %3857, %v4116_v43   ;;  %v623_v33 = vpop.permute.xlu0 %622  ;;  %v3052_v43 = vsel %vm670_vm15, 1.0, %v3894_v50  ;;  %v3022_v6 = vsel %vm464_vm12, 1.0, %v3894_v50 }
  0xd9   : > { %vm667_vm1 = vcmp.eq.s32.totalorder %v623_v33, %v4137_v47  ;;  %v718_v56 = vadd.f32 %v3052_v43, %v606_v51  ;;  %v1089_v51 = vld [vmem:[%s5257_s2 + $0x78] sm:$0xff] }
  0xda   : > { %v3049_v39 = vsel %vm667_vm1, 1.0, %v3894_v50 }
  0xdb   : > { %v715_v45 = vadd.f32 %v3049_v39, %v603_v28  ;;  %v526_v46 = vpop.permute.xlu1 %525  ;;  %v4288_v13 = vadd.f32 %v3068_v61, %v718_v56 }
  0xdc   : > { %v629_v52 = vpop.permute.xlu0 %628  ;;  %3858 = vset.pattern.permute.xlu1 %v3890_v1  ;;  %v1079_v1 = vld [vmem:[%s5257_s2 + $0x28] sm:$0xff]  ;;  %vm560_vm9 = vcmp.eq.s32.totalorder %v526_v46, %v4137_v47 }
  0xdd   : > { %vm669_vm5 = vcmp.eq.s32.totalorder %v629_v52, %v4137_v47  ;;  %v4264_v53 = vadd.f32 %v3065_v31, %v715_v45  ;;  %v3708_v10 = vpack.c.bf16 %v1079_v1, %v1078_v59  ;;  %5292 = vst [vmem:[#allocation7_spill] sm:$0xff] %v4288_v13  ;;  %v3038_v29 = vsel %vm560_vm9, 1.0, %v3894_v50 }
  0xde   : > { %v3051_v57 = vsel %vm669_vm5, 1.0, %v3894_v50  ;;  %v608_v36 = vadd.f32 %v3038_v29, %v3022_v6  ;;  %vm786_vm5 = vcmp.eq.s32.totalorder %v4193_v17, %v4137_v47 }
  0xdf   : > { %5289 = vst [vmem:[#allocation4_spill] sm:$0xff] %v4264_v53  ;;  %v717_v62 = vadd.f32 %v3051_v57, %v605_v49  ;;  %3397 = vmatmul.mubr.f32.vlgmr.msra.gmra.mrb[0].mxu1 %v4264_v53  ;;  %v1088_v49 = vld [vmem:[%s5257_s2 + $0x70] sm:$0xff]  ;;  %v3072_v14 = vsel %vm786_vm5, 1.0, %v3894_v50  ;;  %vm790_vm5 = vcmp.eq.s32.totalorder %v4209_v24, %v4137_v47 }
  0xe0   : > { %v433_v0 = vpop.permute.xlu1 %432  ;;  %3399 = vmatprep.mubr.f32.mxu1 %v4268_v58  ;;  %v635_v2 = vpop.permute.xlu0 %634  ;;  %3703 = vmatpush3.bf16.msra.mxu1 %v4190_v16 }
  0xe1   : > { %vm671_vm7 = vcmp.eq.s32.totalorder %v635_v2, %v4137_v47  ;;  %v4284_v7 = vadd.f32 %v3067_v48, %v717_v62  ;;  %3705 = vmatprep.subr.bf16.mxu1 %v3704_v54  ;;  %vm465_vm8 = vcmp.eq.s32.totalorder %v433_v0, %v4137_v47  ;;  %v3724_v48 = vpack.c.bf16 %v1087_v42, %v1086_v41 }
  0xe2   : > { %v3053_v11 = vsel %vm671_vm7, 1.0, %v3894_v50  ;;  %v3023_v27 = vsel %vm465_vm8, 1.0, %v3894_v50  ;;  %vm787_vm7 = vcmp.eq.s32.totalorder %v4196_v19, %v4137_v47 }
  0xe3   : > { %5291 = vst [vmem:[#allocation6_spill] sm:$0xff] %v4284_v7  ;;  %v719_v16 = vadd.f32 %v3053_v11, %v607_v3  ;;  %3400 = vmatmul.mubr.f32.gmra.mrb[2].mxu1 %v4284_v7  ;;  %v3073_v15 = vsel %vm787_vm7, 1.0, %v3894_v50  ;;  %vm791_vm7 = vcmp.eq.s32.totalorder %v4218_v26, %v4137_v47 }
  0xe4   : > { %3402 = vmatprep.mubr.f32.mxu1 %v4288_v13  ;;  %v641_v18 = vpop.permute.xlu0 %640  ;;  %3707 = vmatpush3.bf16.msra.mxu1 %v3704_v54  ;;  %v3728_v54 = vpack.c.bf16 %v1089_v51, %v1088_v49 }
  0xe5   : > { %v529_v20 = vpop.permute.xlu1 %528  ;;  %v4300_v23 = vadd.f32 %v3069_v8, %v719_v16  ;;  %3709 = vmatprep.subr.bf16.mxu1 %v3708_v10  ;;  %vm673_vm11 = vcmp.eq.s32.totalorder %v641_v18, %v4137_v47 }
  0xe6   : > { %vm561_vm10 = vcmp.eq.s32.totalorder %v529_v20, %v4137_v47  ;;  %v3055_v31 = vsel %vm673_vm11, 1.0, %v3894_v50 }
  0xe7   : > { %5293 = vst [vmem:[#allocation8_spill] sm:$0xff] %v4300_v23  ;;  %v3039_v28 = vsel %vm561_vm10, 1.0, %v3894_v50  ;;  %3403 = vmatmul.mubr.f32.gmra.mrb[4].mxu1 %v4300_v23 }
  0xe8   : > { %v609_v30 = vadd.f32 %v3039_v28, %v3023_v27  ;;  %3711 = vmatpush3.bf16.msra.mxu1 %v3708_v10  ;;  %v647_v56 = vpop.permute.xlu0 %646 }
  0xe9   : > { %3713 = vmatprep.subr.bf16.mxu1 %v3712_v25  ;;  %vm675_vm3 = vcmp.eq.s32.totalorder %v647_v56, %v4137_v47 }
  0xea   : > { %v638_v33 = vpop.permute.xlu1 %637  ;;  %v721_v37 = vadd.f32 %v3055_v31, %v609_v30  ;;  %v3057_v63 = vsel %vm675_vm3, 1.0, %v3894_v50 }
  0xeb   : > { %vm672_vm15 = vcmp.eq.s32.totalorder %v638_v33, %v4137_v47 }
  0xec   : > { %v3054_v38 = vsel %vm672_vm15, 1.0, %v3894_v50  ;;  %3715 = vmatpush3.bf16.msra.mxu1 %v3712_v25  ;;  %v4340_v46 = vadd.f32 %v3071_v12, %v721_v37  ;;  %v653_v19 = vpop.permute.xlu0 %652  ;;  %vm789_vm15 = vcmp.eq.s32.totalorder %v4206_v22, %v4137_v47 }
  0xed   : > { %v720_v39 = vadd.f32 %v3054_v38, %v608_v36  ;;  %3717 = vmatprep.subr.bf16.mxu1 %v3716_v32  ;;  %vm677_vm11 = vcmp.eq.s32.totalorder %v653_v19, %v4137_v47  ;;  %v3074_v36 = vsel %vm788_vm13, 1.0, %v3894_v50 }
  0xee   : > { %5295 = vst [vmem:[#allocation10_spill] sm:$0xff] %v4340_v46  ;;  %v3059_v30 = vsel %vm677_vm11, 1.0, %v3894_v50 }
  0xef   : > { %v436_v43 = vpop.permute.xlu1 %435  ;;  %v4338_v45 = vadd.f32 %v3070_v9, %v720_v39  ;;  %v3075_v9 = vsel %vm789_vm15, 1.0, %v3894_v50 }
  0xf0   : > { %3719 = vmatpush3.bf16.msra.mxu1 %v3716_v32  ;;  %vm466_vm4 = vcmp.eq.s32.totalorder %v436_v43, %v4137_v47  ;;  %v659_v22 = vpop.permute.xlu0 %658 }
  0xf1   : > { %5294 = vst [vmem:[#allocation9_spill] sm:$0xff] %v4338_v45  ;;  %3405 = vmatprep.mubr.f32.mxu1 %v4338_v45  ;;  %3721 = vmatprep.subr.bf16.mxu1 %v3720_v40  ;;  %v3024_v0 = vsel %vm466_vm4, 1.0, %v3894_v50  ;;  %vm679_vm3 = vcmp.eq.s32.totalorder %v659_v22, %v4137_v47 }
  0xf2   : > { %3406 = vmatmul.mubr.f32.gmra.mrb[6].mxu1 %v4340_v46  ;;  %v3061_v49 = vsel %vm679_vm3, 1.0, %v3894_v50 }
  0xf4   : > { %v532_v52 = vpop.permute.xlu1 %531  ;;  %3723 = vmatpush3.bf16.msra.mxu1 %v3720_v40 }
  0xf5   : > { %3725 = vmatprep.subr.bf16.mxu1 %v3724_v48  ;;  %vm562_vm1 = vcmp.eq.s32.totalorder %v532_v52, %v4137_v47 }
  0xf6   : > { %v3040_v61 = vsel %vm562_vm1, 1.0, %v3894_v50 }
  0xf7   : > { %v610_v3 = vadd.f32 %v3040_v61, %v3024_v0 }
  0xf8   : > { %3727 = vmatpush3.bf16.msra.mxu1 %v3724_v48 }
  0xf9   : > { %v439_v55 = vpop.permute.xlu1 %438  ;;  %3729 = vmatprep.subr.bf16.mxu1 %v3728_v54 }
  0xfa   : > { %vm467_vm0 = vcmp.eq.s32.totalorder %v439_v55, %v4137_v47 }
  0xfb   : > { %v3025_v59 = vsel %vm467_vm0, 1.0, %v3894_v50 }
  0xfc   : > { %3731 = vmatpush3.bf16.msra.mxu1 %v3728_v54 }
  0xfe   : > { %v535_v57 = vpop.permute.xlu1 %534 }
  0xff   : > { %vm563_vm2 = vcmp.eq.s32.totalorder %v535_v57, %v4137_v47 }
 0x100   : > { %v3041_v1 = vsel %vm563_vm2, 1.0, %v3894_v50 }
 0x101   : > { %v611_v62 = vadd.f32 %v3041_v1, %v3025_v59  ;;  %v3076_v59 = vsel %vm790_vm5, 1.0, %v3894_v50  ;;  %v3077_v1 = vsel %vm791_vm7, 1.0, %v3894_v50 }
 0x103   : > { %v644_v2 = vpop.permute.xlu1 %643  ;;  %v723_v10 = vadd.f32 %v3057_v63, %v611_v62 }
 0x104   : > { %vm674_vm6 = vcmp.eq.s32.totalorder %v644_v2, %v4137_v47 }
 0x105   : > { %v3056_v8 = vsel %vm674_vm6, 1.0, %v3894_v50  ;;  %v4370_v20 = vadd.f32 %v3073_v15, %v723_v10  ;;  %v665_v10 = vpop.permute.xlu0 %664 }
 0x106   : > { %v722_v11 = vadd.f32 %v3056_v8, %v610_v3  ;;  %vm681_vm13 = vcmp.eq.s32.totalorder %v665_v10, %v4137_v47 }
 0x107   : > { %5297 = vst [vmem:[#allocation12_spill] sm:$0xff] %v4370_v20 }
 0x108   : > { %v442_v16 = vpop.permute.xlu1 %441  ;;  %v4368_v18 = vadd.f32 %v3072_v14, %v722_v11 }
 0x109   : > { %vm468_vm12 = vcmp.eq.s32.totalorder %v442_v16, %v4137_v47 }
 0x10a   : > { %5296 = vst [vmem:[#allocation11_spill] sm:$0xff] %v4368_v18  ;;  %3408 = vmatprep.mubr.f32.mxu1 %v4368_v18  ;;  %v3026_v31 = vsel %vm468_vm12, 1.0, %v3894_v50 }
 0x10b   : > { %3409 = vmatmul.mubr.f32.gmra.mrb[8].mxu1 %v4370_v20 }
 0x10d   : > { %v538_v17 = vpop.permute.xlu1 %537 }
 0x10e   : > { %vm564_vm9 = vcmp.eq.s32.totalorder %v538_v17, %v4137_v47 }
 0x10f   : > { %v3042_v28 = vsel %vm564_vm9, 1.0, %v3894_v50 }
 0x110   : > { %v612_v6 = vadd.f32 %v3042_v28, %v3026_v31 }
 0x112   : > { %v445_v25 = vpop.permute.xlu1 %444 }
 0x113   : > { %vm469_vm8 = vcmp.eq.s32.totalorder %v445_v25, %v4137_v47 }
 0x114   : > { %v3027_v5 = vsel %vm469_vm8, 1.0, %v3894_v50 }
 0x117   : > { %v541_v4 = vpop.permute.xlu1 %540 }
 0x118   : > { %vm565_vm10 = vcmp.eq.s32.totalorder %v541_v4, %v4137_v47 }
 0x119   : > { %v3043_v27 = vsel %vm565_vm10, 1.0, %v3894_v50 }
 0x11a   : > { %v613_v29 = vadd.f32 %v3043_v27, %v3027_v5  ;;  %v3063_v27 = vsel %vm681_vm13, 1.0, %v3894_v50 }
 0x11c   : > { %v650_v32 = vpop.permute.xlu1 %649  ;;  %v725_v33 = vadd.f32 %v3059_v30, %v613_v29 }
 0x11d   : > { %vm676_vm14 = vcmp.eq.s32.totalorder %v650_v32, %v4137_v47 }
 0x11e   : > { %v3058_v34 = vsel %vm676_vm14, 1.0, %v3894_v50  ;;  %v4394_v12 = vadd.f32 %v3075_v9, %v725_v33  ;;  %v4477_v33 = vld [vmem:[%s5259_s4 + $0x18] sm:$0xff] }
 0x11f   : > { %v724_v35 = vadd.f32 %v3058_v34, %v612_v6  ;;  %v4472_v6 = vld [vmem:[%s5259_s4 + $0x10] sm:$0xff] }
 0x120   : > { %5299 = vst [vmem:[#allocation14_spill] sm:$0xff] %v4394_v12  ;;  %v3736_v34 = vpack.c.bf16 %v4477_v33, %v4472_v6 }
 0x121   : > { %v448_v37 = vpop.permute.xlu1 %447  ;;  %v4392_v38 = vadd.f32 %v3074_v36, %v724_v35 }
 0x122   : > { %vm470_vm4 = vcmp.eq.s32.totalorder %v448_v37, %v4137_v47 }
 0x123   : > { %5298 = vst [vmem:[#allocation13_spill] sm:$0xff] %v4392_v38  ;;  %3411 = vmatprep.mubr.f32.mxu1 %v4392_v38  ;;  %v3028_v51 = vsel %vm470_vm4, 1.0, %v3894_v50 }
 0x124   : > { %3412 = vmatmul.mubr.f32.gmra.mrb[10].mxu1 %v4394_v12 }
 0x126   : > { %v544_v21 = vpop.permute.xlu1 %543 }
 0x127   : > { %vm566_vm1 = vcmp.eq.s32.totalorder %v544_v21, %v4137_v47 }
 0x128   : > { %v3044_v43 = vsel %vm566_vm1, 1.0, %v3894_v50  ;;  %vm2934_vm1 = vcmask 7168  }
 0x129   : > { %v614_v54 = vadd.f32 %v3044_v43, %v3028_v51 }
 0x12b   : > { %v451_v39 = vpop.permute.xlu1 %450 }
 0x12c   : > { %vm471_vm0 = vcmp.eq.s32.totalorder %v451_v39, %v4137_v47 }
 0x12d   : > { %v3029_v41 = vsel %vm471_vm0, 1.0, %v3894_v50  ;;  %vm1240_vm0 = vcmask 261120  }
 0x130   : > { %v547_v40 = vpop.permute.xlu1 %546 }
 0x131   : > { %vm567_vm2 = vcmp.eq.s32.totalorder %v547_v40, %v4137_v47 }
 0x132   : > { %v3045_v42 = vsel %vm567_vm2, 1.0, %v3894_v50 }
 0x133   : > { %v615_v48 = vadd.f32 %v3045_v42, %v3029_v41 }
 0x135   : > { %v656_v52 = vpop.permute.xlu1 %655  ;;  %v727_v55 = vadd.f32 %v3061_v49, %v615_v48 }
 0x136   : > { %vm678_vm6 = vcmp.eq.s32.totalorder %v656_v52, %v4137_v47 }
 0x137   : > { %v3060_v56 = vsel %vm678_vm6, 1.0, %v3894_v50  ;;  %v4418_v63 = vadd.f32 %v3077_v1, %v727_v55 }
 0x138   : > { %v726_v57 = vadd.f32 %v3060_v56, %v614_v54 }
 0x139   : > { %5301 = vst [vmem:[#allocation16_spill] sm:$0xff] %v4418_v63 }
 0x13a   : > { %v454_v61 = vpop.permute.xlu1 %453  ;;  %v4416_v62 = vadd.f32 %v3076_v59, %v726_v57 }
 0x13b   : > { %vm472_vm9 = vcmp.eq.s32.totalorder %v454_v61, %v4137_v47 }
 0x13c   : > { %5300 = vst [vmem:[#allocation15_spill] sm:$0xff] %v4416_v62  ;;  %3414 = vmatprep.mubr.f32.mxu1 %v4416_v62  ;;  %v3030_v8 = vsel %vm472_vm9, 1.0, %v3894_v50 }
 0x13d   : > { %3415 = vmatmul.mubr.f32.gmra.mrb[12].mxu1 %v4418_v63 }
 0x13f   : > { %v550_v24 = vpop.permute.xlu1 %549 }
 0x140   : > { %vm568_vm8 = vcmp.eq.s32.totalorder %v550_v24, %v4137_v47 }
 0x141   : > { %v3046_v3 = vsel %vm568_vm8, 1.0, %v3894_v50 }
 0x142   : > { %v616_v15 = vadd.f32 %v3046_v3, %v3030_v8 }
 0x144   : > { %v457_v0 = vpop.permute.xlu1 %456 }
 0x145   : > { %vm473_vm12 = vcmp.eq.s32.totalorder %v457_v0, %v4137_v47 }
 0x146   : > { %v3031_v16 = vsel %vm473_vm12, 1.0, %v3894_v50 }
 0x149   : > { %v553_v26 = vpop.permute.xlu1 %552 }
 0x14a   : > { %vm569_vm10 = vcmp.eq.s32.totalorder %v553_v26, %v4137_v47 }
 0x14b   : > { %v3047_v11 = vsel %vm569_vm10, 1.0, %v3894_v50 }
 0x14c   : > { %v617_v25 = vadd.f32 %v3047_v11, %v3031_v16 }
 0x14e   : > { %v662_v2 = vpop.permute.xlu1 %661  ;;  %v729_v29 = vadd.f32 %v3063_v27, %v617_v25 }
 0x14f   : > { %vm680_vm11 = vcmp.eq.s32.totalorder %v662_v2, %v4137_v47 }
 0x150   : > { %v3062_v14 = vsel %vm680_vm11, 1.0, %v3894_v50 }
 0x151   : > { %v728_v19 = vadd.f32 %v3062_v14, %v616_v15 }
 0x153   : > { %v774_v17 = vpop.permute.xlu1 %773 }
 0x154   : > { %vm792_vm14 = vcmp.eq.s32.totalorder %v774_v17, %v4137_v47 }
 0x155   : > { %v3078_v4 = vsel %vm792_vm14, 1.0, %v3894_v50 }
 0x156   : > { %v4435_v5 = vadd.f32 %v3078_v4, %v728_v19 }
 0x157   : > { %v777_v28 = vpop.permute.xlu1 %776 }
 0x158   : > { %5302 = vst [vmem:[#allocation17_spill] sm:$0xff] %v4435_v5  ;;  %vm793_vm15 = vcmp.eq.s32.totalorder %v777_v28, %v4137_v47  ;;  %3417 = vmatprep.mubr.f32.mxu1 %v4435_v5  ;;  %v4463_v47 = vld [vmem:[%s5259_s4] sm:$0xff] }
 0x159   : > { %v3079_v30 = vsel %vm793_vm15, 1.0, %v3894_v50  ;;  %v1236_v50 = vld [vmem:[%s5259_s4 + $0x8] sm:$0xff] }
 0x15a   : > { %v4441_v31 = vadd.f32 %v3079_v30, %v729_v29  ;;  %v3732_v32 = vpack.c.bf16 %v1236_v50, %v4463_v47  ;;  %v3860_v25 = vpack.i.bf16 %v1236_v50, %v4463_v47  ;;  %v4580_v29 = vpack.i.bf16 %v4477_v33, %v4472_v6 }
 0x15c   : > { %5303 = vst [vmem:[#allocation18_spill] sm:$0xff] %v4441_v31  ;;  %3418 = vmatmul.mubr.f32.gmra.mrb[14].mxu1 %v4441_v31  ;;  %3733 = vmatprep.subr.bf16.mxu0 %v3732_v32 }
 0x15d   : > { %3452 = vmatprep.mubr.f32.mxu1 %v4157_v60  ;;  %3735 = vmatpush3.bf16.msra.mxu0 %v3732_v32  ;;  %v4804_v60 = vld [vmem:[%s5263_s8] sm:$0xf] }
 0x15e   : > { %3737 = vmatprep.subr.bf16.mxu0 %v3736_v34 }
 0x160   : > { %3453 = vmatmul.mubr.f32.vlgmr.msra.gmra.mrb[16].mxu1 %v4264_v53 }
 0x161   : > { %3455 = vmatprep.mubr.f32.mxu1 %v4268_v58  ;;  %3739 = vmatpush3.bf16.msra.mxu0 %v3736_v34  ;;  %v2401_v58 = vadd.f32 1e-05, %v4804_v60 }
 0x163   : > { %3880 = vrsqrt.f32 %v2401_v58  ;;  %v2490_v58 = vld [vmem:[%s5264_s9 + $0x38] sm:$0xff] }
 0x164   : > { %3456 = vmatmul.mubr.f32.gmra.mrb[18].mxu1 %v4284_v7 }
 0x165   : > { %3458 = vmatprep.mubr.f32.mxu1 %v4288_v13 }
 0x168   : > { %3459 = vmatmul.mubr.f32.gmra.mrb[20].mxu1 %v4300_v23 }
 0x169   : > { %3461 = vmatprep.mubr.f32.mxu1 %v4338_v45 }
 0x16c   : > { %3462 = vmatmul.mubr.f32.gmra.mrb[22].mxu1 %v4340_v46 }
 0x16d   : > { %3464 = vmatprep.mubr.f32.mxu1 %v4368_v18 }
 0x170   : > { %3465 = vmatmul.mubr.f32.gmra.mrb[24].mxu1 %v4370_v20 }
 0x171   : > { %3467 = vmatprep.mubr.f32.mxu1 %v4392_v38 }
 0x174   : > { %3468 = vmatmul.mubr.f32.gmra.mrb[26].mxu1 %v4394_v12 }
 0x175   : > { %3470 = vmatprep.mubr.f32.mxu1 %v4416_v62 }
 0x178   : > { %3471 = vmatmul.mubr.f32.gmra.mrb[28].mxu1 %v4418_v63 }
 0x179   : > { %3473 = vmatprep.mubr.f32.mxu1 %v4435_v5 }
 0x17c   : > { %3474 = vmatmul.mubr.f32.gmra.mrb[30].mxu1 %v4441_v31 }
 0x1b2   : > { %v4481_v35 = vpop.f32.mrb[0].mxu1 }
 0x1b3   : > { %5304 = vst [vmem:[#allocation19_spill] sm:$0xff] %v4481_v35  ;;  %v4483_v36 = vpop.f32.mrb[1].mxu1 }
 0x1b4   : > { %5305 = vst [vmem:[#allocation20_spill] sm:$0xff] %v4483_v36 }
 0x1b6   : > { %v4485_v9 = vpop.f32.mrb[2].mxu1 }
 0x1b7   : > { %5306 = vst [vmem:[#allocation21_spill] sm:$0xff] %v4485_v9  ;;  %v4487_v37 = vpop.f32.mrb[3].mxu1 }
 0x1b8   : > { %5307 = vst [vmem:[#allocation22_spill] sm:$0xff] %v4487_v37 }
 0x1ba   : > { %v4489_v21 = vpop.f32.mrb[4].mxu1 }
 0x1bb   : > { %5308 = vst [vmem:[#allocation23_spill] sm:$0xff] %v4489_v21  ;;  %v4491_v39 = vpop.f32.mrb[5].mxu1 }
 0x1bc   : > { %5309 = vst [vmem:[#allocation24_spill] sm:$0xff] %v4491_v39 }
 0x1c5   : > { %v4493_v22 = vpop.f32.mrb[6].mxu1 }
 0x1c6   : > { %5310 = vst [vmem:[#allocation25_spill] sm:$0xff] %v4493_v22  ;;  %v4495_v40 = vpop.f32.mrb[7].mxu1 }
 0x1c7   : > { %5311 = vst [vmem:[#allocation26_spill] sm:$0xff] %v4495_v40 }
 0x1de   : > { %v4497_v41 = vpop.f32.mrb[8].mxu1 }
 0x1df   : > { %5312 = vst [vmem:[#allocation27_spill] sm:$0xff] %v4497_v41  ;;  %v4499_v42 = vpop.f32.mrb[9].mxu1 }
 0x1e0   : > { %5313 = vst [vmem:[#allocation28_spill] sm:$0xff] %v4499_v42 }
 0x1f7   : > { %v4501_v43 = vpop.f32.mrb[10].mxu1 }
 0x1f8   : > { %5314 = vst [vmem:[#allocation29_spill] sm:$0xff] %v4501_v43  ;;  %v4503_v48 = vpop.f32.mrb[11].mxu1 }
 0x1f9   : > { %5315 = vst [vmem:[#allocation30_spill] sm:$0xff] %v4503_v48 }
 0x210   : > { %v4505_v49 = vpop.f32.mrb[12].mxu1 }
 0x211   : > { %5316 = vst [vmem:[#allocation31_spill] sm:$0xff] %v4505_v49  ;;  %v4507_v51 = vpop.f32.mrb[13].mxu1 }
 0x212   : > { %5317 = vst [vmem:[#allocation32_spill] sm:$0xff] %v4507_v51 }
 0x22f   : > { %v4509_v52 = vpop.f32.mrb[14].mxu1 }
 0x230   : > { %5318 = vst [vmem:[#allocation33_spill] sm:$0xff] %v4509_v52  ;;  %v4511_v54 = vpop.f32.mrb[15].mxu1 }
 0x231   : > { %5319 = vst [vmem:[#allocation34_spill] sm:$0xff] %v4511_v54 }
 0x233   : > { %v4513_v55 = vpop.f32.mrb[16].mxu1 }
 0x234   : > { %5320 = vst [vmem:[#allocation35_spill] sm:$0xff] %v4513_v55  ;;  %v4515_v56 = vpop.f32.mrb[17].mxu1 }
 0x235   : > { %5321 = vst [vmem:[#allocation36_spill] sm:$0xff] %v4515_v56  ;;  %3484 = vmatprep.mubr.msk.f32.mxu0 %vm1240_vm0, %v4515_v56 }
 0x236   : > { %3485 = vmatmul.mubr.msk.f32.vlgmr.msra.gmra.mrb[0].mxu0 %vm1240_vm0, %v4513_v55 }
 0x237   : > { %v4521_v57 = vpop.f32.mrb[18].mxu1 }
 0x238   : > { %v4523_v59 = vpop.f32.mrb[19].mxu1 }
 0x239   : > { %5322 = vst [vmem:[#allocation37_spill] sm:$0xff] %v4523_v59  ;;  %3487 = vmatprep.mubr.msk.f32.mxu0 %vm1240_vm0, %v4523_v59 }
 0x23a   : > { %3488 = vmatmul.mubr.msk.f32.gmra.mrb[2].mxu0 %vm1240_vm0, %v4521_v57 }
 0x23b   : > { %v4529_v1 = vpop.f32.mrb[20].mxu1 }
 0x23c   : > { %v4531_v61 = vpop.f32.mrb[21].mxu1 }
 0x23d   : > { %3490 = vmatprep.mubr.msk.f32.mxu0 %vm1240_vm0, %v4531_v61 }
 0x23e   : > { %3491 = vmatmul.mubr.msk.f32.gmra.mrb[4].mxu0 %vm1240_vm0, %v4529_v1 }
 0x23f   : > { %v4537_v24 = vpop.f32.mrb[22].mxu1 }
 0x240   : > { %v4539_v0 = vpop.f32.mrb[23].mxu1 }
 0x241   : > { %3493 = vmatprep.mubr.msk.f32.mxu0 %vm1240_vm0, %v4539_v0 }
 0x242   : > { %3494 = vmatmul.mubr.msk.f32.gmra.mrb[6].mxu0 %vm1240_vm0, %v4537_v24 }
 0x243   : > { %v4545_v26 = vpop.f32.mrb[24].mxu1 }
 0x244   : > { %v4547_v2 = vpop.f32.mrb[25].mxu1 }
 0x245   : > { %3496 = vmatprep.mubr.msk.f32.mxu0 %vm1240_vm0, %v4547_v2 }
 0x246   : > { %3497 = vmatmul.mubr.msk.f32.gmra.mrb[8].mxu0 %vm1240_vm0, %v4545_v26 }
 0x247   : > { %v4553_v3 = vpop.f32.mrb[26].mxu1 }
 0x248   : > { %v4555_v10 = vpop.f32.mrb[27].mxu1 }
 0x249   : > { %3499 = vmatprep.mubr.msk.f32.mxu0 %vm1240_vm0, %v4555_v10 }
 0x24a   : > { %3500 = vmatmul.mubr.msk.f32.gmra.mrb[10].mxu0 %vm1240_vm0, %v4553_v3 }
 0x24b   : > { %v4561_v8 = vpop.f32.mrb[28].mxu1 }
 0x24c   : > { %v4563_v11 = vpop.f32.mrb[29].mxu1 }
 0x24d   : > { %3502 = vmatprep.mubr.msk.f32.mxu0 %vm1240_vm0, %v4563_v11 }
 0x24e   : > { %3503 = vmatmul.mubr.msk.f32.gmra.mrb[12].mxu0 %vm1240_vm0, %v4561_v8 }
 0x24f   : > { %v4569_v14 = vpop.f32.mrb[30].mxu1 }
 0x250   : > { %v4571_v15 = vpop.f32.mrb[31].mxu1 }
 0x251   : > { %3505 = vmatprep.mubr.msk.f32.mxu0 %vm1240_vm0, %v4571_v15 }
 0x252   : > { %3506 = vmatmul.mubr.msk.f32.gmra.mrb[14].mxu0 %vm1240_vm0, %v4569_v14 }
 0x309   : > { %v3486_v16 = vpop.f32.mrb[0].mxu0 }
 0x30a   : > { %1441 = vperm.xlu1 %3858, %v3486_v16   ;;  %v1355_v17 = vpop.f32.mrb[1].mxu0 }
 0x30b   : > { %1436 = vperm.xlu0 %3859, %v1355_v17  }
 0x30d   : > { %v3489_v19 = vpop.f32.mrb[2].mxu0 }
 0x30e   : > { %1451 = vperm.xlu1 %3858, %v3489_v19   ;;  %v1365_v4 = vpop.f32.mrb[3].mxu0 }
 0x30f   : > { %3861 = vrot.lane.b32.xlu0 %v3860_v25, %s3895_s30 }
 0x311   : > { %v3492_v27 = vpop.f32.mrb[4].mxu0 }
 0x312   : > { %1446 = vperm.xlu1 %3858, %v1365_v4   ;;  %v1375_v28 = vpop.f32.mrb[5].mxu0  ;;  %v4585_v4 = vshrl.u32 %v408_v44, 7 }
 0x313   : > { %1456 = vperm.xlu0 %3859, %v1375_v28   ;;  %v4593_v28 = vld [vmem:[%s5260_s5] sm:$0x7] }
 0x314   : > { %5323 = vst [vmem:[#allocation38_spill] sm:$0xff] %v4593_v28 }
 0x315   : > { %v3495_v30 = vpop.f32.mrb[6].mxu0 }
 0x316   : > { %3866 = vrot.lane.b32.xlu1 %v4580_v29, %s3895_s30  ;;  %v1385_v32 = vpop.f32.mrb[7].mxu0 }
 0x317   : > { %1461 = vperm.xlu0 %3859, %v3492_v27   ;;  %v4588_v27 = vsub.s32 0, %v4585_v4 }
 0x319   : > { %v3498_v34 = vpop.f32.mrb[8].mxu0 }
 0x31a   : > { %1466 = vperm.xlu1 %3858, %v1385_v32   ;;  %v1395_v47 = vpop.f32.mrb[9].mxu0 }
 0x31b   : > { %1471 = vperm.xlu0 %3859, %v3495_v30   ;;  %v4597_v30 = vrot.slane %v4593_v28, %v4588_v27 }
 0x31d   : > { %v3501_v50 = vpop.f32.mrb[10].mxu0 }
 0x31e   : > { %1476 = vperm.xlu1 %3858, %v1395_v47   ;;  %v1405_v16 = vpop.f32.mrb[11].mxu0 }
 0x31f   : > { %1481 = vperm.xlu0 %3859, %v3498_v34  }
 0x321   : > { %v3504_v17 = vpop.f32.mrb[12].mxu0 }
 0x322   : > { %1486 = vperm.xlu1 %3858, %v1405_v16   ;;  %v1415_v19 = vpop.f32.mrb[13].mxu0 }
 0x323   : > { %1491 = vperm.xlu0 %3859, %v3501_v50  }
 0x325   : > { %v3507_v6 = vpop.f32.mrb[14].mxu0 }
 0x326   : > { %1496 = vperm.xlu1 %3858, %v1415_v19   ;;  %v1425_v33 = vpop.f32.mrb[15].mxu0 }
 0x327   : > { %1501 = vperm.xlu0 %3859, %v3504_v17  }
 0x32a   : > { %1506 = vperm.xlu1 %3858, %v1425_v33  }
 0x32b   : > { %1511 = vperm.xlu0 %3859, %v3507_v6  }
 0x32f   : > { %3871 = vrot.lane.b32.xlu0 %v3860_v25, %s3896_s12 }
 0x389   : > { %v1442_v32 = vpop.permute.xlu1 %1441 }
 0x38a   : > { %v1437_v34 = vpop.permute.xlu0 %1436  ;;  %v1515_v31 = vmul.f32 %v4513_v55, %v1442_v32 }
 0x38b   : > { %v1514_v47 = vmul.f32 %v1437_v34, %v4515_v56 }
 0x38c   : > { %v1535_v63 = vadd.f32 %v4597_v30, %v1515_v31 }
 0x38d   : > { %v1534_v25 = vadd.f32 %v4597_v30, %v1514_v47  ;;  %v1452_v44 = vpop.permute.xlu1 %1451 }
 0x38e   : > { %v3862_v50 = vpop.permute.xlu0 %3861  ;;  %v1517_v32 = vmul.f32 %v4521_v57, %v1452_v44  ;;  %v4621_v31 = vadd.f32 %v4513_v55, %v1535_v63 }
 0x38f   : > { %v4602_v16 = vadd.f32 %v1534_v25, %v4515_v56  ;;  %v3864_v17 = vunpack.i.h.bf16 %v3862_v50  ;;  %v3863_v19 = vunpack.i.l.bf16 %v3862_v50  ;;  %v2244_v25 = vld [vmem:[%s5261_s6] sm:$0xff]  ;;  %v2245_v50 = vld [vmem:[%s5261_s6 + $0x8] sm:$0xff] }
 0x390   : > { %v1537_v44 = vadd.f32 %v4597_v30, %v1517_v32 }
 0x391   : > { %v3740_v6 = vpack.c.bf16 %v3864_v17, %v3863_v19  ;;  %v1447_v33 = vpop.permute.xlu1 %1446  ;;  %3516 = vmatprep.mubr.msk.f32.mxu0 %vm1240_vm0, %v4602_v16 }
 0x392   : > { %v1457_v52 = vpop.permute.xlu0 %1456  ;;  %v1516_v34 = vmul.f32 %v1447_v33, %v4523_v59 }
 0x393   : > { %3741 = vmatprep.subr.bf16.mxu0 %v3740_v6  ;;  %3780 = vmatprep.subr.bf16.mxu1 %v3740_v6  ;;  %v1518_v5 = vmul.f32 %v1457_v52, %v4531_v61 }
 0x394   : > { %3743 = vmatpush3.bf16.msra.mxu0 %v3740_v6  ;;  %3782 = vmatpush3.bf16.msra.mxu1 %v3740_v6  ;;  %v3756_v6 = vpack.c.bf16 %v2245_v50, %v2244_v25  ;;  %v1536_v33 = vadd.f32 %v4597_v30, %v1516_v34 }
 0x395   : > { %v3867_v47 = vpop.permute.xlu1 %3866  ;;  %v1538_v63 = vadd.f32 %v4597_v30, %v1518_v5 }
 0x396   : > { %v3869_v17 = vunpack.i.h.bf16 %v3867_v47  ;;  %v3868_v19 = vunpack.i.l.bf16 %v3867_v47  ;;  %v1462_v49 = vpop.permute.xlu0 %1461  ;;  %v4633_v52 = vadd.f32 %v1536_v33, %v4523_v59 }
 0x397   : > { %v1519_v47 = vmul.f32 %v4529_v1, %v1462_v49 }
 0x398   : > { %v3744_v54 = vpack.c.bf16 %v3869_v17, %v3868_v19 }
 0x399   : > { %v1467_v43 = vpop.permute.xlu1 %1466  ;;  %v1539_v32 = vadd.f32 %v4597_v30, %v1519_v47 }
 0x39a   : > { %v1520_v12 = vmul.f32 %v1467_v43, %v4539_v0  ;;  %3745 = vmatprep.subr.bf16.mxu0 %v3744_v54  ;;  %v1472_v51 = vpop.permute.xlu0 %1471  ;;  %3781 = vmatprep.subr.bf16.mxu1 %v3744_v54  ;;  %v2246_v43 = vld [vmem:[%s5261_s6 + $0x10] sm:$0xff] }
 0x39b   : > { %v1521_v62 = vmul.f32 %v4537_v24, %v1472_v51  ;;  %3747 = vmatpush3.bf16.msra.mxu0 %v3744_v54  ;;  %3783 = vmatpush3.bf16.msra.mxu1 %v3744_v54  ;;  %v2247_v51 = vld [vmem:[%s5261_s6 + $0x18] sm:$0xff] }
 0x39c   : > { %v1540_v34 = vadd.f32 %v4597_v30, %v1520_v12  ;;  %3757 = vmatprep.subr.bf16.mxu1 %v3756_v6  ;;  %v3760_v5 = vpack.c.bf16 %v2247_v51, %v2246_v43 }
 0x39d   : > { %v1541_v54 = vadd.f32 %v4597_v30, %v1521_v62  ;;  %v1477_v25 = vpop.permute.xlu1 %1476  ;;  %v4650_v62 = vadd.f32 %v4521_v57, %v1537_v44 }
 0x39e   : > { %v4638_v49 = vadd.f32 %v1540_v34, %v4539_v0  ;;  %v1522_v12 = vmul.f32 %v1477_v25, %v4547_v2  ;;  %v1482_v50 = vpop.permute.xlu0 %1481  ;;  %3517 = vmatmul.mubr.msk.f32.vlgmr.msra.gmra.mrb[16].mxu0 %vm1240_vm0, %v4621_v31  ;;  %v4657_v34 = vadd.f32 %v1538_v63, %v4531_v61 }
 0x39f   : > { %v4644_v17 = vadd.f32 %v4537_v24, %v1541_v54  ;;  %v1523_v19 = vmul.f32 %v4545_v26, %v1482_v50  ;;  %3519 = vmatprep.mubr.msk.f32.mxu0 %vm1240_vm0, %v4633_v52 }
 0x3a0   : > { %v1542_v33 = vadd.f32 %v4597_v30, %v1522_v12  ;;  %3525 = vmatprep.mubr.msk.f32.mxu1 %vm1240_vm0, %v4638_v49  ;;  %v4675_v12 = vadd.f32 %v4529_v1, %v1539_v32 }
 0x3a1   : > { %v1543_v54 = vadd.f32 %v4597_v30, %v1523_v19  ;;  %3526 = vmatmul.mubr.msk.f32.vlgmr.msra.gmra.mrb[32].mxu1 %vm1240_vm0, %v4644_v17  ;;  %v1487_v25 = vpop.permute.xlu1 %1486 }
 0x3a2   : > { %v4663_v43 = vadd.f32 %v1542_v33, %v4547_v2  ;;  %v1524_v44 = vmul.f32 %v1487_v25, %v4555_v10  ;;  %v1492_v47 = vpop.permute.xlu0 %1491  ;;  %3520 = vmatmul.mubr.msk.f32.gmra.mrb[18].mxu0 %vm1240_vm0, %v4650_v62  ;;  %3759 = vmatpush3.bf16.msra.mxu1 %v3756_v6 }
 0x3a3   : > { %v4669_v51 = vadd.f32 %v4545_v26, %v1543_v54  ;;  %v1525_v63 = vmul.f32 %v4553_v3, %v1492_v47  ;;  %3522 = vmatprep.mubr.msk.f32.mxu0 %vm1240_vm0, %v4657_v34  ;;  %3761 = vmatprep.subr.bf16.mxu1 %v3760_v5 }
 0x3a4   : > { %v1544_v50 = vadd.f32 %v4597_v30, %v1524_v44  ;;  %3528 = vmatprep.mubr.msk.f32.mxu1 %vm1240_vm0, %v4663_v43 }
 0x3a5   : > { %v1545_v19 = vadd.f32 %v4597_v30, %v1525_v63  ;;  %3529 = vmatmul.mubr.msk.f32.gmra.mrb[34].mxu1 %vm1240_vm0, %v4669_v51  ;;  %v1497_v6 = vpop.permute.xlu1 %1496 }
 0x3a6   : > { %v4684_v33 = vadd.f32 %v1544_v50, %v4555_v10  ;;  %v1526_v54 = vmul.f32 %v1497_v6, %v4563_v11  ;;  %v1502_v25 = vpop.permute.xlu0 %1501  ;;  %3523 = vmatmul.mubr.msk.f32.gmra.mrb[20].mxu0 %vm1240_vm0, %v4675_v12  ;;  %3763 = vmatpush3.bf16.msra.mxu1 %v3760_v5 }
 0x3a7   : > { %v4690_v32 = vadd.f32 %v4553_v3, %v1545_v19  ;;  %v1527_v44 = vmul.f32 %v4561_v8, %v1502_v25 }
 0x3a8   : > { %v1546_v47 = vadd.f32 %v4597_v30, %v1526_v54  ;;  %3531 = vmatprep.mubr.msk.f32.mxu1 %vm1240_vm0, %v4684_v33 }
 0x3a9   : > { %v1547_v63 = vadd.f32 %v4597_v30, %v1527_v44  ;;  %3532 = vmatmul.mubr.msk.f32.gmra.mrb[36].mxu1 %vm1240_vm0, %v4690_v32  ;;  %v1507_v50 = vpop.permute.xlu1 %1506 }
 0x3aa   : > { %v4700_v6 = vadd.f32 %v1546_v47, %v4563_v11  ;;  %v1528_v5 = vmul.f32 %v1507_v50, %v4571_v15  ;;  %v1512_v19 = vpop.permute.xlu0 %1511 }
 0x3ab   : > { %v4704_v41 = vadd.f32 %v4561_v8, %v1547_v63  ;;  %v1529_v54 = vmul.f32 %v4569_v14, %v1512_v19 }
 0x3ac   : > { %v1548_v25 = vadd.f32 %v4597_v30, %v1528_v5  ;;  %3534 = vmatprep.mubr.msk.f32.mxu1 %vm1240_vm0, %v4700_v6 }
 0x3ad   : > { %v1549_v44 = vadd.f32 %v4597_v30, %v1529_v54  ;;  %3535 = vmatmul.mubr.msk.f32.gmra.mrb[38].mxu1 %vm1240_vm0, %v4704_v41 }
 0x3ae   : > { %v4714_v47 = vadd.f32 %v1548_v25, %v4571_v15  ;;  %v3872_v30 = vpop.permute.xlu0 %3871 }
 0x3af   : > { %v4717_v50 = vadd.f32 %v4569_v14, %v1549_v44  ;;  %v3874_v63 = vunpack.i.h.bf16 %v3872_v30  ;;  %v3873_v5 = vunpack.i.l.bf16 %v3872_v30 }
 0x3b0   : > { %3537 = vmatprep.mubr.msk.f32.mxu1 %vm1240_vm0, %v4714_v47 }
 0x3b1   : > { %3538 = vmatmul.mubr.msk.f32.gmra.mrb[40].mxu1 %vm1240_vm0, %v4717_v50  ;;  %v3748_v19 = vpack.c.bf16 %v3874_v63, %v3873_v5 }
 0x3b2   : > { %3580 = vmatprep.mubr.msk.f32.mxu1 %vm1240_vm0, %v4515_v56 }
 0x3b3   : > { %3749 = vmatprep.subr.bf16.mxu0 %v3748_v19 }
 0x3b4   : > { %3751 = vmatpush3.bf16.msra.mxu0 %v3748_v19 }
 0x3b5   : > { %3581 = vmatmul.mubr.msk.f32.vlgmr.msra.gmra.mrb[42].mxu1 %vm1240_vm0, %v4513_v55 }
 0x3b6   : > { %3583 = vmatprep.mubr.msk.f32.mxu1 %vm1240_vm0, %v4523_v59 }
 0x3b9   : > { %3584 = vmatmul.mubr.msk.f32.gmra.mrb[44].mxu1 %vm1240_vm0, %v4521_v57 }
 0x3ba   : > { %3586 = vmatprep.mubr.msk.f32.mxu1 %vm1240_vm0, %v4531_v61 }
 0x3bd   : > { %3587 = vmatmul.mubr.msk.f32.gmra.mrb[46].mxu1 %vm1240_vm0, %v4529_v1 }
 0x3be   : > { %3589 = vmatprep.mubr.msk.f32.mxu1 %vm1240_vm0, %v4539_v0 }
 0x3c1   : > { %3590 = vmatmul.mubr.msk.f32.gmra.mrb[48].mxu1 %vm1240_vm0, %v4537_v24 }
 0x3c2   : > { %3592 = vmatprep.mubr.msk.f32.mxu1 %vm1240_vm0, %v4547_v2 }
 0x3c5   : > { %3593 = vmatmul.mubr.msk.f32.gmra.mrb[50].mxu1 %vm1240_vm0, %v4545_v26 }
 0x3c6   : > { %3595 = vmatprep.mubr.msk.f32.mxu1 %vm1240_vm0, %v4555_v10 }
 0x3c9   : > { %3596 = vmatmul.mubr.msk.f32.gmra.mrb[52].mxu1 %vm1240_vm0, %v4553_v3 }
 0x3ca   : > { %3598 = vmatprep.mubr.msk.f32.mxu1 %vm1240_vm0, %v4563_v11 }
 0x3cd   : > { %3599 = vmatmul.mubr.msk.f32.gmra.mrb[54].mxu1 %vm1240_vm0, %v4561_v8 }
 0x3ce   : > { %3601 = vmatprep.mubr.msk.f32.mxu1 %vm1240_vm0, %v4571_v15 }
 0x3d1   : > { %3602 = vmatmul.mubr.msk.f32.gmra.mrb[56].mxu1 %vm1240_vm0, %v4569_v14 }
 0x471   : > { %v3518_v54 = vpop.f32.mrb[16].mxu0 }
 0x472   : > { %1782 = vperm.xlu0 %3859, %v3518_v54   ;;  %v1696_v25 = vpop.f32.mrb[17].mxu0 }
 0x473   : > { %1777 = vperm.xlu1 %3858, %v1696_v25  }
 0x474   : > { %v3527_v44 = vpop.f32.mrb[32].mxu1 }
 0x475   : > { %v3521_v20 = vpop.f32.mrb[18].mxu0  ;;  %v1726_v48 = vpop.f32.mrb[33].mxu1 }
 0x476   : > { %v1706_v38 = vpop.f32.mrb[19].mxu0 }
 0x477   : > { %1792 = vperm.xlu1 %3858, %v3521_v20  }
 0x478   : > { %v3530_v22 = vpop.f32.mrb[34].mxu1 }
 0x479   : > { %v3524_v46 = vpop.f32.mrb[20].mxu0  ;;  %v1736_v42 = vpop.f32.mrb[35].mxu1 }
 0x47a   : > { %v1716_v18 = vpop.f32.mrb[21].mxu0 }
 0x47b   : > { %1787 = vperm.xlu1 %3858, %v1706_v38   ;;  %1797 = vperm.xlu0 %3859, %v1716_v18  }
 0x47c   : > { %v3533_v21 = vpop.f32.mrb[36].mxu1 }
 0x47d   : > { %v1746_v30 = vpop.f32.mrb[37].mxu1 }
 0x47f   : > { %3876 = vrot.lane.b32.xlu1 %v4580_v29, %s3896_s12  ;;  %1802 = vperm.xlu0 %3859, %v3524_v46  }
 0x480   : > { %v3536_v63 = vpop.f32.mrb[38].mxu1 }
 0x481   : > { %v1756_v5 = vpop.f32.mrb[39].mxu1 }
 0x483   : > { %1807 = vperm.xlu1 %3858, %v1726_v48   ;;  %1812 = vperm.xlu0 %3859, %v3527_v44  }
 0x484   : > { %v3539_v19 = vpop.f32.mrb[40].mxu1 }
 0x485   : > { %v1766_v54 = vpop.f32.mrb[41].mxu1 }
 0x487   : > { %1817 = vperm.xlu1 %3858, %v1736_v42   ;;  %1822 = vperm.xlu0 %3859, %v3530_v22  }
 0x488   : > { %v4757_v20 = vpop.f32.mrb[42].mxu1 }
 0x489   : > { %v4759_v25 = vpop.f32.mrb[43].mxu1 }
 0x48b   : > { %1827 = vperm.xlu1 %3858, %v1746_v30   ;;  %1832 = vperm.xlu0 %3859, %v3533_v21  }
 0x48c   : > { %v4761_v18 = vpop.f32.mrb[44].mxu1 }
 0x48d   : > { %v4763_v38 = vpop.f32.mrb[45].mxu1 }
 0x48f   : > { %1837 = vperm.xlu1 %3858, %v1756_v5   ;;  %1842 = vperm.xlu0 %3859, %v3536_v63  }
 0x490   : > { %v4765_v46 = vpop.f32.mrb[46].mxu1 }
 0x491   : > { %v4767_v48 = vpop.f32.mrb[47].mxu1 }
 0x493   : > { %1847 = vperm.xlu1 %3858, %v1766_v54   ;;  %1852 = vperm.xlu0 %3859, %v3539_v19   ;;  %v4790_v19 = vsub.s32 1, %v4585_v4 }
 0x494   : > { %v4769_v42 = vpop.f32.mrb[48].mxu1 }
 0x495   : > { %v4771_v22 = vpop.f32.mrb[49].mxu1  ;;  %v4794_v40 = vrot.slane %v4593_v28, %v4790_v19 }
 0x498   : > { %v4773_v29 = vpop.f32.mrb[50].mxu1 }
 0x499   : > { %v4775_v44 = vpop.f32.mrb[51].mxu1 }
 0x49c   : > { %v4777_v21 = vpop.f32.mrb[52].mxu1 }
 0x49d   : > { %5324 = vst [vmem:[#allocation39_spill] sm:$0xff] %v4777_v21  ;;  %v4779_v30 = vpop.f32.mrb[53].mxu1  ;;  %v2489_v21 = vld [vmem:[%s5264_s9 + $0x30] sm:$0xff] }
 0x4a0   : > { %v4781_v5 = vpop.f32.mrb[54].mxu1 }
 0x4a1   : > { %5325 = vst [vmem:[#allocation40_spill] sm:$0xff] %v4781_v5  ;;  %v4783_v63 = vpop.f32.mrb[55].mxu1 }
 0x4a2   : > { %5326 = vst [vmem:[#allocation41_spill] sm:$0xff] %v4783_v63 }
 0x4a4   : > { %v4785_v23 = vpop.f32.mrb[56].mxu1 }
 0x4a5   : > { %5327 = vst [vmem:[#allocation42_spill] sm:$0xff] %v4785_v23  ;;  %v4787_v54 = vpop.f32.mrb[57].mxu1 }
 0x4a6   : > { %5328 = vst [vmem:[#allocation43_spill] sm:$0xff] %v4787_v54 }
 0x4f1   : > { %v1783_v39 = vpop.permute.xlu0 %1782 }
 0x4f2   : > { %v1778_v45 = vpop.permute.xlu1 %1777 }
 0x4f3   : > { %v1855_v9 = vmul.f32 %v1778_v45, %v4515_v56  ;;  %v1856_v45 = vmul.f32 %v4513_v55, %v1783_v39 }
 0x4f5   : > { %v1875_v7 = vadd.f32 %v4794_v40, %v1855_v9  ;;  %v1876_v23 = vadd.f32 %v4794_v40, %v1856_v45 }
 0x4f6   : > { %v1793_v13 = vpop.permute.xlu1 %1792 }
 0x4f7   : > { %v4799_v36 = vadd.f32 %v1875_v7, %v4602_v16  ;;  %v2487_v7 = vld [vmem:[%s5264_s9 + $0x20] sm:$0xff]  ;;  %v2488_v16 = vld [vmem:[%s5264_s9 + $0x28] sm:$0xff]  ;;  %v1858_v54 = vmul.f32 %v4521_v57, %v1793_v13  ;;  %v4828_v13 = vadd.f32 %v1876_v23, %v4621_v31  ;;  %v3881_v23 = vpop.eup %3880 }
 0x4f8   : > { %v3764_v55 = vpack.c.bf16 %v2488_v16, %v2487_v7 }
 0x4f9   : > { %5329 = vst [vmem:[#allocation44_spill] sm:$0xff] %v4799_v36  ;;  %3548 = vmatprep.mubr.msk.f32.mxu0 %vm1240_vm0, %v4799_v36 }
 0x4fa   : > { %v1788_v28 = vpop.permute.xlu1 %1787  ;;  %v1798_v37 = vpop.permute.xlu0 %1797 }
 0x4fb   : > { %v1857_v9 = vmul.f32 %v1788_v28, %v4523_v59  ;;  %v1859_v59 = vmul.f32 %v1798_v37, %v4531_v61  ;;  %v3768_v37 = vpack.c.bf16 %v2490_v58, %v2489_v21  ;;  %v4864_v58 = vld [vmem:[%s5262_s7] ss:$0 sm:$0xff] }
 0x4fd   : > { %v1877_v28 = vadd.f32 %v4794_v40, %v1857_v9  ;;  %v1879_v45 = vadd.f32 %v4794_v40, %v1859_v59 }
 0x4fe   : > { %v3877_v56 = vpop.permute.xlu1 %3876  ;;  %v1803_v35 = vpop.permute.xlu0 %1802 }
 0x4ff   : > { %v3879_v36 = vunpack.i.h.bf16 %v3877_v56  ;;  %v3878_v53 = vunpack.i.l.bf16 %v3877_v56  ;;  %v4833_v56 = vadd.f32 %v1877_v28, %v4633_v52  ;;  %v4847_v59 = vadd.f32 %v1879_v45, %v4657_v34 }
 0x501   : > { %v3752_v39 = vpack.c.bf16 %v3879_v36, %v3878_v53  ;;  %v1878_v53 = vadd.f32 %v4794_v40, %v1858_v54  ;;  %v1860_v36 = vmul.f32 %v4529_v1, %v1803_v35 }
 0x502   : > { %v1808_v5 = vpop.permute.xlu1 %1807  ;;  %v1813_v63 = vpop.permute.xlu0 %1812 }
 0x503   : > { %3753 = vmatprep.subr.bf16.mxu0 %v3752_v39  ;;  %v1861_v9 = vmul.f32 %v1808_v5, %v4539_v0  ;;  %v4842_v35 = vadd.f32 %v1878_v53, %v4650_v62  ;;  %v1880_v31 = vadd.f32 %v4794_v40, %v1860_v36  ;;  %v1862_v52 = vmul.f32 %v4537_v24, %v1813_v63 }
 0x504   : > { %3755 = vmatpush3.bf16.msra.mxu0 %v3752_v39  ;;  %v2404_v62 = vrot.slane %v3881_v23, 3 }
 0x505   : > { %3765 = vmatprep.subr.bf16.mxu0 %v3764_v55  ;;  %v1881_v21 = vadd.f32 %v4794_v40, %v1861_v9  ;;  %v4857_v63 = vadd.f32 %v1880_v31, %v4675_v12  ;;  %v1882_v34 = vadd.f32 %v4794_v40, %v1862_v52 }
 0x506   : > { %v1818_v7 = vpop.permute.xlu1 %1817  ;;  %v1823_v16 = vpop.permute.xlu0 %1822  ;;  %v2406_v12 = vmul.f32 %v2404_v62, %v4804_v60 }
 0x507   : > { %3549 = vmatmul.mubr.msk.f32.vlgmr.msra.gmra.mrb[22].mxu0 %vm1240_vm0, %v4828_v13  ;;  %v1863_v5 = vmul.f32 %v1818_v7, %v4547_v2  ;;  %v1864_v28 = vmul.f32 %v4545_v26, %v1823_v16  ;;  %v4867_v53 = vadd.f32 %v1881_v21, %v4638_v49  ;;  %v2322_v49 = vadd.f32 %v4864_v58, %v4759_v25 }
 0x508   : > { %3551 = vmatprep.mubr.msk.f32.mxu0 %vm1240_vm0, %v4833_v56  ;;  %3767 = vmatpush3.bf16.msra.mxu0 %v3764_v55  ;;  %v2210_v55 = vsub.s32 2, %v4585_v4  ;;  %v4884_v16 = vadd.f32 %v1882_v34, %v4644_v17  ;;  %v2327_v25 = vadd.f32 %v4757_v20, %v4864_v58  ;;  %v4898_v17 = vrot.slane %v2406_v12, %v4588_v27  ;;  %v5371_v4 = vld [vmem:[#allocation37_spill] sm:$0xff] }
 0x509   : > { %3769 = vmatprep.subr.bf16.mxu0 %v3768_v37  ;;  %v1883_v36 = vadd.f32 %v4794_v40, %v1863_v5  ;;  %v1884_v23 = vadd.f32 %v4794_v40, %v1864_v28  ;;  %v2332_v28 = vadd.f32 %v4864_v58, %v4763_v38  ;;  %v4920_v12 = vrot.slane %v4804_v60, %v4790_v19 }
 0x50a   : > { %v1828_v54 = vpop.permute.xlu1 %1827  ;;  %v1833_v39 = vpop.permute.xlu0 %1832  ;;  %v4877_v9 = vrot.slane %v4804_v60, %v2210_v55  ;;  %v2337_v38 = vadd.f32 %v4761_v18, %v4864_v58  ;;  %v2342_v60 = vadd.f32 %v4864_v58, %v4767_v48  ;;  %v2352_v48 = vadd.f32 %v4864_v58, %v4771_v22 }
 0x50b   : > { %3552 = vmatmul.mubr.msk.f32.gmra.mrb[24].mxu0 %vm1240_vm0, %v4842_v35  ;;  %v1865_v45 = vmul.f32 %v1828_v54, %v4555_v10  ;;  %v1866_v31 = vmul.f32 %v4553_v3, %v1833_v39  ;;  %v4889_v52 = vadd.f32 %v1883_v36, %v4663_v43  ;;  %v4904_v39 = vadd.f32 %v1884_v23, %v4669_v51 }
 0x50c   : > { %3554 = vmatprep.mubr.msk.f32.mxu0 %vm1240_vm0, %v4847_v59  ;;  %3771 = vmatpush3.bf16.msra.mxu0 %v3768_v37  ;;  %v2411_v43 = vsub.f32 %v2322_v49, %v4877_v9  ;;  %v2412_v51 = vsub.f32 %v2327_v25, %v4877_v9 }
 0x50d   : > { %v1885_v21 = vadd.f32 %v4794_v40, %v1865_v45  ;;  %v1886_v62 = vadd.f32 %v4794_v40, %v1866_v31  ;;  %v2413_v31 = vsub.f32 %v2332_v28, %v4877_v9 }
 0x50e   : > { %v1838_v37 = vpop.permute.xlu1 %1837  ;;  %v1843_v7 = vpop.permute.xlu0 %1842 }
 0x50f   : > { %3555 = vmatmul.mubr.msk.f32.gmra.mrb[26].mxu0 %vm1240_vm0, %v4857_v63  ;;  %v1867_v5 = vmul.f32 %v1838_v37, %v4563_v11  ;;  %v1868_v34 = vmul.f32 %v4561_v8, %v1843_v7  ;;  %v4911_v20 = vadd.f32 %v1885_v21, %v4684_v33  ;;  %v2431_v33 = vmul.f32 %v4898_v17, %v2411_v43 }
 0x510   : > { %3557 = vmatprep.mubr.msk.f32.mxu0 %vm1240_vm0, %v4867_v53  ;;  %v4928_v7 = vadd.f32 %v1886_v62, %v4690_v32  ;;  %v2432_v32 = vmul.f32 %v4898_v17, %v2412_v51  ;;  %v2433_v62 = vmul.f32 %v4898_v17, %v2413_v31  ;;  %v2367_v31 = vadd.f32 %v4773_v29, %v4864_v58 }
 0x511   : > { %v1887_v36 = vadd.f32 %v4794_v40, %v1867_v5  ;;  %v1888_v49 = vadd.f32 %v4794_v40, %v1868_v34  ;;  %v2347_v5 = vadd.f32 %v4765_v46, %v4864_v58  ;;  %v2451_v43 = vadd.f32 %v4920_v12, %v2431_v33 }
 0x512   : > { %v1848_v54 = vpop.permute.xlu1 %1847  ;;  %v1853_v37 = vpop.permute.xlu0 %1852  ;;  %v2415_v34 = vsub.f32 %v2342_v60, %v4877_v9  ;;  %v2420_v29 = vsub.f32 %v2367_v31, %v4877_v9 }
 0x513   : > { %3558 = vmatmul.mubr.msk.f32.gmra.mrb[28].mxu0 %vm1240_vm0, %v4884_v16  ;;  %v1869_v45 = vmul.f32 %v1848_v54, %v4571_v15  ;;  %v1870_v23 = vmul.f32 %v4569_v14, %v1853_v37  ;;  %v4936_v21 = vadd.f32 %v1887_v36, %v4700_v6  ;;  %v2414_v54 = vsub.f32 %v2337_v38, %v4877_v9 }
 0x514   : > { %3560 = vmatprep.mubr.msk.f32.mxu0 %vm1240_vm0, %v4889_v52  ;;  %v4950_v6 = vadd.f32 %v1888_v49, %v4704_v41  ;;  %v2416_v28 = vsub.f32 %v2347_v5, %v4877_v9  ;;  %v2357_v41 = vadd.f32 %v4769_v42, %v4864_v58  ;;  %v2417_v36 = vsub.f32 %v2352_v48, %v4877_v9 }
 0x515   : > { %v1889_v18 = vadd.f32 %v4794_v40, %v1869_v45  ;;  %v1890_v25 = vadd.f32 %v4794_v40, %v1870_v23  ;;  %v2452_v40 = vadd.f32 %v4920_v12, %v2432_v32  ;;  %v2434_v22 = vmul.f32 %v4898_v17, %v2414_v54 }
 0x516   : > { %v2467_v45 = vmax.f32 %v2451_v43, 0.0  ;;  %v2453_v37 = vadd.f32 %v4920_v12, %v2433_v62  ;;  %v2435_v51 = vmul.f32 %v4898_v17, %v2415_v34  ;;  %v2362_v42 = vadd.f32 %v4864_v58, %v4775_v44  ;;  %v5330_v43 = vld [vmem:[#allocation39_spill] sm:$0xff] }
 0x517   : > { %3561 = vmatmul.mubr.msk.f32.gmra.mrb[30].mxu0 %vm1240_vm0, %v4904_v39  ;;  %v4957_v46 = vadd.f32 %v1889_v18, %v4714_v47  ;;  %v4970_v47 = vadd.f32 %v1890_v25, %v4717_v50  ;;  %v2436_v38 = vmul.f32 %v4898_v17, %v2416_v28  ;;  %v2418_v33 = vsub.f32 %v2357_v41, %v4877_v9  ;;  %v5331_v41 = vld [vmem:[#allocation41_spill] sm:$0xff] }
 0x518   : > { %3563 = vmatprep.mubr.msk.f32.mxu0 %vm1240_vm0, %v4911_v20  ;;  %v2468_v49 = vmax.f32 %v2452_v40, 0.0  ;;  %v2454_v50 = vadd.f32 %v4920_v12, %v2434_v22  ;;  %v2437_v23 = vmul.f32 %v4898_v17, %v2417_v36  ;;  %v2469_v60 = vmax.f32 %v2453_v37, 0.0 }
 0x519   : > { %v2455_v44 = vadd.f32 %v4920_v12, %v2435_v51  ;;  %v2419_v18 = vsub.f32 %v2362_v42, %v4877_v9  ;;  %v2372_v32 = vadd.f32 %v4864_v58, %v4779_v30  ;;  %v2456_v5 = vadd.f32 %v4920_v12, %v2436_v38  ;;  %v5332_v42 = vld [vmem:[#allocation40_spill] sm:$0xff] }
 0x51a   : > { %v2438_v54 = vmul.f32 %v4898_v17, %v2418_v33  ;;  %v2470_v48 = vmax.f32 %v2454_v50, 0.0  ;;  %v2457_v25 = vadd.f32 %v4920_v12, %v2437_v23  ;;  %v2377_v62 = vadd.f32 %v5330_v43, %v4864_v58  ;;  %v5333_v23 = vld [vmem:[#allocation43_spill] sm:$0xff] }
 0x51b   : > { %3564 = vmatmul.mubr.msk.f32.gmra.mrb[32].mxu0 %vm1240_vm0, %v4928_v7  ;;  %v2471_v34 = vmax.f32 %v2455_v44, 0.0  ;;  %v2439_v28 = vmul.f32 %v4898_v17, %v2419_v18  ;;  %v2421_v30 = vsub.f32 %v2372_v32, %v4877_v9  ;;  %v2382_v40 = vadd.f32 %v4864_v58, %v5331_v41 }
 0x51c   : > { %3566 = vmatprep.mubr.msk.f32.mxu0 %vm1240_vm0, %v4936_v21  ;;  %v2472_v22 = vmax.f32 %v2456_v5, 0.0  ;;  %v2458_v36 = vadd.f32 %v4920_v12, %v2438_v54  ;;  %v2440_v37 = vmul.f32 %v4898_v17, %v2420_v29  ;;  %v2422_v51 = vsub.f32 %v2377_v62, %v4877_v9  ;;  %v5334_v5 = vld [vmem:[#allocation42_spill] sm:$0xff] }
 0x51d   : > { %v2387_v38 = vadd.f32 %v5332_v42, %v4864_v58  ;;  %v2459_v33 = vadd.f32 %v4920_v12, %v2439_v28  ;;  %v2423_v50 = vsub.f32 %v2382_v40, %v4877_v9  ;;  %v2392_v31 = vadd.f32 %v4864_v58, %v5333_v23 }
 0x51e   : > { %v2460_v44 = vadd.f32 %v4920_v12, %v2440_v37  ;;  %v2442_v18 = vmul.f32 %v4898_v17, %v2422_v51  ;;  %v2397_v54 = vadd.f32 %v5334_v5, %v4864_v58 }
 0x51f   : > { %3567 = vmatmul.mubr.msk.f32.gmra.mrb[34].mxu0 %vm1240_vm0, %v4950_v6  ;;  %v2424_v32 = vsub.f32 %v2387_v38, %v4877_v9  ;;  %v2443_v29 = vmul.f32 %v4898_v17, %v2423_v50  ;;  %v2425_v43 = vsub.f32 %v2392_v31, %v4877_v9  ;;  %v2485_v31 = vld [vmem:[%s5264_s9 + $0x10] sm:$0xff] }
 0x520   : > { %3569 = vmatprep.mubr.msk.f32.mxu0 %vm1240_vm0, %v4957_v46  ;;  %v2476_v62 = vmax.f32 %v2460_v44, 0.0 }
 0x521   : > { %v2444_v28 = vmul.f32 %v4898_v17, %v2424_v32  ;;  %v2463_v58 = vadd.f32 %v4920_v12, %v2443_v29  ;;  %v2445_v40 = vmul.f32 %v4898_v17, %v2425_v43 }
 0x523   : > { %3570 = vmatmul.mubr.msk.f32.gmra.mrb[36].mxu0 %vm1240_vm0, %v4970_v47  ;;  %v2479_v37 = vmax.f32 %v2463_v58, 0.0  ;;  %v2465_v51 = vadd.f32 %v4920_v12, %v2445_v40  ;;  %v5335_v40 = vld [vmem:[#allocation4_spill] sm:$0xff] }
 0x524   : > { %3612 = vmatprep.mubr.msk.f32.mxu0 %vm1240_vm0, %v2467_v45  ;;  %v2473_v45 = vmax.f32 %v2457_v25, 0.0 }
 0x525   : > { %v2481_v38 = vmax.f32 %v2465_v51, 0.0 }
 0x527   : > { %3613 = vmatmul.mubr.msk.f32.vlgmr.msra.gmra.mrb[38].mxu0 %vm1240_vm0, %v2468_v49  ;;  %v2441_v49 = vmul.f32 %v4898_v17, %v2421_v30  ;;  %v2426_v30 = vsub.f32 %v2397_v54, %v4877_v9 }
 0x528   : > { %3615 = vmatprep.mubr.msk.f32.mxu0 %vm1240_vm0, %v2469_v60  ;;  %v2474_v60 = vmax.f32 %v2458_v36, 0.0  ;;  %v2464_v36 = vadd.f32 %v4920_v12, %v2444_v28 }
 0x529   : > { %v2461_v25 = vadd.f32 %v4920_v12, %v2441_v49  ;;  %v2484_v49 = vld [vmem:[%s5264_s9 + $0x8] sm:$0xff] }
 0x52a   : > { %v2480_v9 = vmax.f32 %v2464_v36, 0.0 }
 0x52b   : > { %3616 = vmatmul.mubr.msk.f32.gmra.mrb[40].mxu0 %vm1240_vm0, %v2470_v48  ;;  %v2475_v48 = vmax.f32 %v2459_v33, 0.0  ;;  %v2477_v41 = vmax.f32 %v2461_v25, 0.0 }
 0x52c   : > { %3618 = vmatprep.mubr.msk.f32.mxu0 %vm1240_vm0, %v2471_v34  ;;  %v2462_v34 = vadd.f32 %v4920_v12, %v2442_v18 }
 0x52f   : > { %3619 = vmatmul.mubr.msk.f32.gmra.mrb[42].mxu0 %vm1240_vm0, %v2472_v22  ;;  %v2478_v22 = vmax.f32 %v2462_v34, 0.0 }
 0x530   : > { %3621 = vmatprep.mubr.msk.f32.mxu0 %vm1240_vm0, %v2473_v45  ;;  %v2446_v45 = vmul.f32 %v4898_v17, %v2426_v30  ;;  %v2483_v17 = vld [vmem:[%s5264_s9] sm:$0xff] }
 0x531   : > { %v3772_v50 = vpack.c.bf16 %v2484_v49, %v2483_v17  ;;  %v5342_v17 = vld [vmem:[#allocation24_spill] sm:$0xff] }
 0x532   : > { %v2466_v42 = vadd.f32 %v4920_v12, %v2446_v45  ;;  %v5337_v45 = vld [vmem:[#allocation5_spill] sm:$0xff] }
 0x533   : > { %3622 = vmatmul.mubr.msk.f32.gmra.mrb[44].mxu0 %vm1240_vm0, %v2474_v60  ;;  %3773 = vmatprep.subr.bf16.mxu0 %v3772_v50  ;;  %v2486_v60 = vld [vmem:[%s5264_s9 + $0x18] sm:$0xff] }
 0x534   : > { %3624 = vmatprep.mubr.msk.f32.mxu0 %vm1240_vm0, %v2475_v48  ;;  %v2482_v33 = vmax.f32 %v2466_v42, 0.0  ;;  %3775 = vmatpush3.bf16.msra.mxu0 %v3772_v50  ;;  %v3776_v18 = vpack.c.bf16 %v2486_v60, %v2485_v31  ;;  %v5340_v42 = vld [vmem:[#allocation20_spill] sm:$0xff]  ;;  %v5343_v50 = vld [vmem:[#allocation6_spill] sm:$0xff]  ;;  %v5345_v31 = vld [vmem:[#allocation9_spill] sm:$0xff] }
 0x535   : > { %v5346_v60 = vld [vmem:[#allocation26_spill] sm:$0xff] }
 0x536   : > { %3777 = vmatprep.subr.bf16.mxu0 %v3776_v18 }
 0x537   : > { %3625 = vmatmul.mubr.msk.f32.gmra.mrb[46].mxu0 %vm1240_vm0, %v2476_v62 }
 0x538   : > { %3627 = vmatprep.mubr.msk.f32.mxu0 %vm1240_vm0, %v2477_v41  ;;  %3779 = vmatpush3.bf16.msra.mxu0 %v3776_v18  ;;  %v5347_v18 = vld [vmem:[#allocation8_spill] sm:$0xff] }
 0x53b   : > { %3628 = vmatmul.mubr.msk.f32.gmra.mrb[48].mxu0 %vm1240_vm0, %v2478_v22  ;;  %v5336_v22 = vld [vmem:[#allocation19_spill] sm:$0xff] }
 0x53c   : > { %3630 = vmatprep.mubr.msk.f32.mxu0 %vm1240_vm0, %v2479_v37  ;;  %v1004_v36 = vmul.f32 %v5336_v22, %v5335_v40  ;;  %v5338_v37 = vld [vmem:[#allocation22_spill] sm:$0xff]  ;;  %v5357_v22 = vld [vmem:[#allocation15_spill] sm:$0xff] }
 0x53d   : > { %v1005_v51 = vmul.f32 %v5338_v37, %v5337_v45  ;;  %v5359_v37 = vld [vmem:[#allocation14_spill] sm:$0xff] }
 0x53f   : > { %3631 = vmatmul.mubr.msk.f32.gmra.mrb[50].mxu0 %vm1240_vm0, %v2480_v9  ;;  %v5339_v9 = vld [vmem:[#allocation3_spill] sm:$0xff] }
 0x540   : > { %3633 = vmatprep.mubr.msk.f32.mxu0 %vm1240_vm0, %v2481_v38  ;;  %v1003_v38 = vmul.f32 %v5340_v42, %v5339_v9  ;;  %v5361_v42 = vld [vmem:[#allocation17_spill] sm:$0xff] }
 0x543   : > { %3634 = vmatmul.mubr.msk.f32.gmra.mrb[52].mxu0 %vm1240_vm0, %v2482_v33  ;;  %v5341_v33 = vld [vmem:[#allocation7_spill] sm:$0xff] }
 0x544   : > { %v1007_v49 = vmul.f32 %v5342_v17, %v5341_v33  ;;  %v5363_v17 = vld [vmem:[#allocation16_spill] sm:$0xff] }
 0x5da   : > { %v3550_v12 = vpop.f32.mrb[22].mxu0 }
 0x5db   : > { %2119 = vperm.xlu0 %3859, %v3550_v12   ;;  %v2033_v23 = vpop.f32.mrb[23].mxu0  ;;  %v5344_v12 = vld [vmem:[#allocation21_spill] sm:$0xff] }
 0x5dc   : > { %2114 = vperm.xlu1 %3858, %v2033_v23   ;;  %v1006_v23 = vmul.f32 %v5344_v12, %v5343_v50  ;;  %v5365_v12 = vld [vmem:[#allocation18_spill] sm:$0xff] }
 0x5de   : > { %v3553_v44 = vpop.f32.mrb[24].mxu0 }
 0x5df   : > { %2129 = vperm.xlu0 %3859, %v3553_v44   ;;  %v2043_v32 = vpop.f32.mrb[25].mxu0  ;;  %v1009_v44 = vmul.f32 %v5346_v60, %v5345_v31  ;;  %v5367_v60 = vld [vmem:[#allocation38_spill] sm:$0xff] }
 0x5e0   : > { %2124 = vperm.xlu1 %3858, %v2043_v32   ;;  %v5348_v32 = vld [vmem:[#allocation23_spill] sm:$0xff] }
 0x5e2   : > { %v3556_v5 = vpop.f32.mrb[26].mxu0 }
 0x5e3   : > { %2139 = vperm.xlu0 %3859, %v3556_v5   ;;  %v2053_v54 = vpop.f32.mrb[27].mxu0  ;;  %v1008_v5 = vmul.f32 %v5348_v32, %v5347_v18  ;;  %v5368_v32 = vld [vmem:[#allocation35_spill] sm:$0xff] }
 0x5e4   : > { %2134 = vperm.xlu1 %3858, %v2053_v54   ;;  %v5349_v54 = vld [vmem:[#allocation11_spill] sm:$0xff] }
 0x5e6   : > { %v3559_v48 = vpop.f32.mrb[28].mxu0 }
 0x5e7   : > { %2149 = vperm.xlu0 %3859, %v3559_v48   ;;  %v2063_v25 = vpop.f32.mrb[29].mxu0  ;;  %v5350_v48 = vld [vmem:[#allocation28_spill] sm:$0xff] }
 0x5e8   : > { %2144 = vperm.xlu1 %3858, %v2063_v25   ;;  %v1011_v25 = vmul.f32 %v5350_v48, %v5349_v54  ;;  %v5369_v48 = vld [vmem:[#allocation36_spill] sm:$0xff] }
 0x5ea   : > { %v3562_v29 = vpop.f32.mrb[30].mxu0 }
 0x5eb   : > { %2159 = vperm.xlu0 %3859, %v3562_v29   ;;  %v2073_v43 = vpop.f32.mrb[31].mxu0  ;;  %v5351_v29 = vld [vmem:[#allocation10_spill] sm:$0xff] }
 0x5ec   : > { %2154 = vperm.xlu1 %3858, %v2073_v43   ;;  %v5352_v43 = vld [vmem:[#allocation25_spill] sm:$0xff] }
 0x5ee   : > { %v3565_v62 = vpop.f32.mrb[32].mxu0 }
 0x5ef   : > { %2169 = vperm.xlu0 %3859, %v3565_v62   ;;  %v2083_v34 = vpop.f32.mrb[33].mxu0  ;;  %v1010_v62 = vmul.f32 %v5352_v43, %v5351_v29 }
 0x5f0   : > { %2164 = vperm.xlu1 %3858, %v2083_v34   ;;  %v5353_v34 = vld [vmem:[#allocation13_spill] sm:$0xff] }
 0x5f2   : > { %v3568_v28 = vpop.f32.mrb[34].mxu0 }
 0x5f3   : > { %2179 = vperm.xlu0 %3859, %v3568_v28   ;;  %v2093_v30 = vpop.f32.mrb[35].mxu0  ;;  %v5354_v28 = vld [vmem:[#allocation30_spill] sm:$0xff] }
 0x5f4   : > { %2174 = vperm.xlu1 %3858, %v2093_v30   ;;  %v1013_v30 = vmul.f32 %v5354_v28, %v5353_v34 }
 0x5f6   : > { %v3571_v41 = vpop.f32.mrb[36].mxu0 }
 0x5f7   : > { %2189 = vperm.xlu0 %3859, %v3571_v41   ;;  %v2103_v58 = vpop.f32.mrb[37].mxu0  ;;  %v5355_v41 = vld [vmem:[#allocation12_spill] sm:$0xff] }
 0x5f8   : > { %2184 = vperm.xlu1 %3858, %v2103_v58   ;;  %v5356_v58 = vld [vmem:[#allocation27_spill] sm:$0xff] }
 0x5f9   : > { %v1012_v40 = vmul.f32 %v5356_v58, %v5355_v41 }
 0x616   : > { %1021 = vadd.xlane.f32.xlu0 %v1004_v36  ;;  %v5358_v36 = vld [vmem:[#allocation32_spill] sm:$0xff] }
 0x617   : > { %v1015_v45 = vmul.f32 %v5358_v36, %v5357_v22 }
 0x61a   : > { %1023 = vadd.xlane.f32.xlu0 %v1005_v51  ;;  %v5360_v51 = vld [vmem:[#allocation29_spill] sm:$0xff] }
 0x61b   : > { %v1014_v9 = vmul.f32 %v5360_v51, %v5359_v37 }
 0x61c   : > { %1019 = vadd.xlane.f32.xlu1 %v1003_v38  ;;  %v5362_v38 = vld [vmem:[#allocation34_spill] sm:$0xff] }
 0x61d   : > { %v1017_v33 = vmul.f32 %v5362_v38, %v5361_v42 }
 0x61e   : > { %1027 = vadd.xlane.f32.xlu0 %v1007_v49  ;;  %v5364_v49 = vld [vmem:[#allocation31_spill] sm:$0xff] }
 0x61f   : > { %v1016_v50 = vmul.f32 %v5364_v49, %v5363_v17 }
 0x620   : > { %1025 = vadd.xlane.f32.xlu1 %v1006_v23  ;;  %v5366_v23 = vld [vmem:[#allocation33_spill] sm:$0xff] }
 0x621   : > { %v1018_v31 = vmul.f32 %v5366_v23, %v5365_v12 }
 0x622   : > { %1031 = vadd.xlane.f32.xlu0 %v1009_v44  ;;  %v5088_v44 = vrot.slane %v5367_v60, %v2210_v55 }
 0x624   : > { %1029 = vadd.xlane.f32.xlu1 %v1008_v5 }
 0x626   : > { %1035 = vadd.xlane.f32.xlu0 %v1011_v25 }
 0x628   : > { %1033 = vadd.xlane.f32.xlu1 %v1010_v62 }
 0x62a   : > { %1039 = vadd.xlane.f32.xlu0 %v1013_v30  ;;  %v5370_v30 = vld [vmem:[#allocation44_spill] sm:$0xff] }
 0x62c   : > { %1037 = vadd.xlane.f32.xlu1 %v1012_v40 }
 0x62e   : > { %1043 = vadd.xlane.f32.xlu0 %v1015_v45 }
 0x630   : > { %1041 = vadd.xlane.f32.xlu1 %v1014_v9 }
 0x632   : > { %1047 = vadd.xlane.f32.xlu0 %v1017_v33 }
 0x634   : > { %1045 = vadd.xlane.f32.xlu1 %v1016_v50 }
 0x638   : > { %1049 = vadd.xlane.f32.xlu1 %v1018_v31 }
 0x65a   : > { %v2120_v18 = vpop.permute.xlu0 %2119 }
 0x65b   : > { %v2193_v5 = vmul.f32 %v5368_v32, %v2120_v18  ;;  %v2115_v54 = vpop.permute.xlu1 %2114 }
 0x65c   : > { %v2192_v25 = vmul.f32 %v2115_v54, %v5369_v48 }
 0x65d   : > { %v2213_v29 = vadd.f32 %v5088_v44, %v2193_v5 }
 0x65e   : > { %v2212_v43 = vadd.f32 %v5088_v44, %v2192_v25  ;;  %v2130_v62 = vpop.permute.xlu0 %2129 }
 0x65f   : > { %v2195_v34 = vmul.f32 %v4521_v57, %v2130_v62  ;;  %v2125_v28 = vpop.permute.xlu1 %2124  ;;  %v2229_v55 = vadd.f32 %v2213_v29, %v4828_v13 }
 0x660   : > { %v2228_v41 = vadd.f32 %v2212_v43, %v5370_v30  ;;  %v2194_v58 = vmul.f32 %v2125_v28, %v5371_v4 }
 0x661   : > { %v2215_v40 = vadd.f32 %v5088_v44, %v2195_v34 }
 0x662   : > { %v2214_v22 = vadd.f32 %v5088_v44, %v2194_v58  ;;  %3644 = vmatprep.mubr.msk.f32.mxu0 %vm1240_vm0, %v2228_v41  ;;  %v2140_v36 = vpop.permute.xlu0 %2139 }
 0x663   : > { %v2197_v45 = vmul.f32 %v4529_v1, %v2140_v36  ;;  %3645 = vmatmul.mubr.msk.f32.vlgmr.msra.gmra.mrb[38].mxu0 %vm1240_vm0, %v2229_v55  ;;  %v2135_v37 = vpop.permute.xlu1 %2134  ;;  %v2231_v9 = vadd.f32 %v2215_v40, %v4842_v35  ;;  %v2877_v55 = vld [vmem:[%s5265_s10] sm:$0x3] }
 0x664   : > { %v2230_v57 = vadd.f32 %v2214_v22, %v4833_v56  ;;  %v2196_v51 = vmul.f32 %v2135_v37, %v4531_v61  ;;  %v5164_v40 = vrot.slane %v2877_v55, %v4790_v19 }
 0x665   : > { %v2217_v13 = vadd.f32 %v5088_v44, %v2197_v45 }
 0x666   : > { %v2216_v42 = vadd.f32 %v5088_v44, %v2196_v51  ;;  %3647 = vmatprep.mubr.msk.f32.mxu0 %vm1240_vm0, %v2230_v57  ;;  %v2150_v38 = vpop.permute.xlu0 %2149 }
 0x667   : > { %v2199_v33 = vmul.f32 %v4537_v24, %v2150_v38  ;;  %3648 = vmatmul.mubr.msk.f32.gmra.mrb[40].mxu0 %vm1240_vm0, %v2231_v9  ;;  %v2145_v1 = vpop.permute.xlu1 %2144  ;;  %v2233_v61 = vadd.f32 %v2217_v13, %v4857_v63 }
 0x668   : > { %v2232_v17 = vadd.f32 %v2216_v42, %v4847_v59  ;;  %v2198_v56 = vmul.f32 %v2145_v1, %v4539_v0 }
 0x669   : > { %v2219_v35 = vadd.f32 %v5088_v44, %v2199_v33 }
 0x66a   : > { %v2218_v49 = vadd.f32 %v5088_v44, %v2198_v56  ;;  %3650 = vmatprep.mubr.msk.f32.mxu0 %vm1240_vm0, %v2232_v17  ;;  %v2160_v50 = vpop.permute.xlu0 %2159 }
 0x66b   : > { %v2201_v12 = vmul.f32 %v4545_v26, %v2160_v50  ;;  %3651 = vmatmul.mubr.msk.f32.gmra.mrb[42].mxu0 %vm1240_vm0, %v2233_v61  ;;  %v2155_v24 = vpop.permute.xlu1 %2154  ;;  %v2235_v0 = vadd.f32 %v2219_v35, %v4884_v16 }
 0x66c   : > { %v2234_v23 = vadd.f32 %v2218_v49, %v4867_v53  ;;  %v2200_v59 = vmul.f32 %v2155_v24, %v4547_v2 }
 0x66d   : > { %v2221_v63 = vadd.f32 %v5088_v44, %v2201_v12 }
 0x66e   : > { %v2220_v31 = vadd.f32 %v5088_v44, %v2200_v59  ;;  %3653 = vmatprep.mubr.msk.f32.mxu0 %vm1240_vm0, %v2234_v23  ;;  %v2170_v60 = vpop.permute.xlu0 %2169 }
 0x66f   : > { %v2203_v18 = vmul.f32 %v4553_v3, %v2170_v60  ;;  %3654 = vmatmul.mubr.msk.f32.gmra.mrb[44].mxu0 %vm1240_vm0, %v2235_v0  ;;  %v2165_v26 = vpop.permute.xlu1 %2164  ;;  %v2237_v2 = vadd.f32 %v2221_v63, %v4904_v39 }
 0x670   : > { %v2236_v32 = vadd.f32 %v2220_v31, %v4889_v52  ;;  %v2202_v53 = vmul.f32 %v2165_v26, %v4555_v10 }
 0x671   : > { %v2223_v16 = vadd.f32 %v5088_v44, %v2203_v18 }
 0x672   : > { %v2222_v5 = vadd.f32 %v5088_v44, %v2202_v53  ;;  %3656 = vmatprep.mubr.msk.f32.mxu0 %vm1240_vm0, %v2236_v32  ;;  %v2180_v54 = vpop.permute.xlu0 %2179 }
 0x673   : > { %v2205_v48 = vmul.f32 %v4561_v8, %v2180_v54  ;;  %3657 = vmatmul.mubr.msk.f32.gmra.mrb[46].mxu0 %vm1240_vm0, %v2237_v2  ;;  %v2175_v3 = vpop.permute.xlu1 %2174  ;;  %v2239_v10 = vadd.f32 %v2223_v16, %v4928_v7 }
 0x674   : > { %v2238_v25 = vadd.f32 %v2222_v5, %v4911_v20  ;;  %v2204_v52 = vmul.f32 %v2175_v3, %v4563_v11 }
 0x675   : > { %v2225_v39 = vadd.f32 %v5088_v44, %v2205_v48 }
 0x676   : > { %v2224_v29 = vadd.f32 %v5088_v44, %v2204_v52  ;;  %3659 = vmatprep.mubr.msk.f32.mxu0 %vm1240_vm0, %v2238_v25  ;;  %v2190_v43 = vpop.permute.xlu0 %2189 }
 0x677   : > { %v2207_v62 = vmul.f32 %v4569_v14, %v2190_v43  ;;  %3660 = vmatmul.mubr.msk.f32.gmra.mrb[48].mxu0 %vm1240_vm0, %v2239_v10  ;;  %v2185_v8 = vpop.permute.xlu1 %2184  ;;  %v2241_v11 = vadd.f32 %v2225_v39, %v4950_v6 }
 0x678   : > { %v2240_v34 = vadd.f32 %v2224_v29, %v4936_v21  ;;  %v2206_v20 = vmul.f32 %v2185_v8, %v4571_v15 }
 0x679   : > { %v2227_v7 = vadd.f32 %v5088_v44, %v2207_v62 }
 0x67a   : > { %v2226_v28 = vadd.f32 %v5088_v44, %v2206_v20  ;;  %3662 = vmatprep.mubr.msk.f32.mxu0 %vm1240_vm0, %v2240_v34  ;;  %v5154_v44 = vld [vmem:[#allocation2] ss:$0 sm:$0xff] }
 0x67b   : > { %3663 = vmatmul.mubr.msk.f32.gmra.mrb[50].mxu0 %vm1240_vm0, %v2241_v11  ;;  %v2243_v14 = vadd.f32 %v2227_v7, %v4970_v47 }
 0x67c   : > { %v2242_v30 = vadd.f32 %v2226_v28, %v4957_v46  ;;  %v5160_v46 = vrot.slane %v2877_v55, %v4588_v27 }
 0x67e   : > { %3665 = vmatprep.mubr.msk.f32.mxu0 %vm1240_vm0, %v2242_v30 }
 0x67f   : > { %3666 = vmatmul.mubr.msk.f32.gmra.mrb[52].mxu0 %vm1240_vm0, %v2243_v14 }
 0x6a3   : > { %v1022_v15 = vpop.xlane.xlu0 %1021 }
 0x6a4   : > { %v1059_v47 = vadd.f32 %v5154_v44, %v1022_v15 }
 0x6a6   : > { %v2883_v57 = vmul.f32 %v5160_v46, %v1059_v47 }
 0x6a7   : > { %v1024_v6 = vpop.xlane.xlu0 %1023 }
 0x6a8   : > { %v1060_v27 = vadd.f32 %v5154_v44, %v1024_v6 }
 0x6a9   : > { %v1020_v21 = vpop.xlane.xlu1 %1019 }
 0x6aa   : > { %v1058_v22 = vadd.f32 %v5154_v44, %v1020_v21  ;;  %v2884_v12 = vmul.f32 %v5160_v46, %v1060_v27 }
 0x6ab   : > { %v1028_v58 = vpop.xlane.xlu0 %1027 }
 0x6ac   : > { %v2882_v19 = vmul.f32 %v5160_v46, %v1058_v22  ;;  %v1062_v24 = vadd.f32 %v5154_v44, %v1028_v58 }
 0x6ad   : > { %v1026_v41 = vpop.xlane.xlu1 %1025 }
 0x6ae   : > { %v1061_v51 = vadd.f32 %v5154_v44, %v1026_v41  ;;  %v2886_v32 = vmul.f32 %v5160_v46, %v1062_v24 }
 0x6af   : > { %v1032_v45 = vpop.xlane.xlu0 %1031 }
 0x6b0   : > { %v2885_v56 = vmul.f32 %v5160_v46, %v1061_v51  ;;  %v1064_v53 = vadd.f32 %v5154_v44, %v1032_v45 }
 0x6b1   : > { %v1030_v4 = vpop.xlane.xlu1 %1029 }
 0x6b2   : > { %v1063_v61 = vadd.f32 %v5154_v44, %v1030_v4  ;;  %v2888_v29 = vmul.f32 %v5160_v46, %v1064_v53 }
 0x6b3   : > { %v1036_v35 = vpop.xlane.xlu0 %1035 }
 0x6b4   : > { %v2887_v31 = vmul.f32 %v5160_v46, %v1063_v61  ;;  %v1066_v43 = vadd.f32 %v5154_v44, %v1036_v35 }
 0x6b5   : > { %v1034_v36 = vpop.xlane.xlu1 %1033 }
 0x6b6   : > { %v1065_v60 = vadd.f32 %v5154_v44, %v1034_v36  ;;  %v2890_v15 = vmul.f32 %v5160_v46, %v1066_v43 }
 0x6b7   : > { %v1040_v5 = vpop.xlane.xlu0 %1039 }
 0x6b8   : > { %v2889_v25 = vmul.f32 %v5160_v46, %v1065_v60  ;;  %v1068_v41 = vadd.f32 %v5154_v44, %v1040_v5 }
 0x6b9   : > { %v1038_v33 = vpop.xlane.xlu1 %1037 }
 0x6ba   : > { %v1067_v52 = vadd.f32 %v5154_v44, %v1038_v33 }
 0x6bb   : > { %v1044_v28 = vpop.xlane.xlu0 %1043 }
 0x6bc   : > { %v2891_v7 = vmul.f32 %v5160_v46, %v1067_v52 }
 0x6bd   : > { %v1042_v2 = vpop.xlane.xlu1 %1041 }
 0x6be   : > { %v1069_v30 = vadd.f32 %v5154_v44, %v1042_v2 }
 0x6c0   : > { %v2893_v47 = vmul.f32 %v5160_v46, %v1069_v30 }
 0x6c1   : > { %v1046_v34 = vpop.xlane.xlu1 %1045 }
 0x6c2   : > { %v1071_v22 = vadd.f32 %v5154_v44, %v1046_v34 }
 0x6c5   : > { %v1050_v51 = vpop.xlane.xlu1 %1049 }
 0x6c6   : > { %v1073_v33 = vadd.f32 %v5154_v44, %v1050_v51 }
 0x6c8   : > { %v2897_v24 = vmul.f32 %v5160_v46, %v1073_v33 }
 0x736   : > { %v3646_v37 = vpop.f32.mrb[38].mxu0 }
 0x737   : > { %v2903_v9 = vmul.f32 %v3646_v37, %v5164_v40  ;;  %v2798_v13 = vpop.f32.mrb[39].mxu0  ;;  %v2892_v37 = vmul.f32 %v5160_v46, %v1068_v41 }
 0x738   : > { %v2902_v42 = vmul.f32 %v5164_v40, %v2798_v13  ;;  %v1048_v13 = vpop.xlane.xlu0 %1047 }
 0x739   : > { %v2919_v38 = vadd.f32 %v2903_v9, %v2883_v57  ;;  %v1070_v57 = vadd.f32 %v5154_v44, %v1044_v28  ;;  %v1072_v61 = vadd.f32 %v5154_v44, %v1048_v13 }
 0x73a   : > { %v2918_v1 = vadd.f32 %v2902_v42, %v2882_v19  ;;  %v3649_v17 = vpop.f32.mrb[40].mxu0 }
 0x73b   : > { %2936 = vst.msk [vmem:[%s5175_s13 + $0x8] sm:$0xff] %vm2934_vm1, %v2919_v38  ;;  %v2905_v49 = vmul.f32 %v3649_v17, %v5164_v40  ;;  %v2808_v50 = vpop.f32.mrb[41].mxu0  ;;  %v2895_v38 = vmul.f32 %v5160_v46, %v1071_v22 }
 0x73c   : > { %2935 = vst.msk [vmem:[%s5175_s13] sm:$0xff] %vm2934_vm1, %v2918_v1  ;;  %v2904_v23 = vmul.f32 %v5164_v40, %v2808_v50 }
 0x73d   : > { %v2921_v59 = vadd.f32 %v2905_v49, %v2885_v56  ;;  %v2894_v56 = vmul.f32 %v5160_v46, %v1070_v57 }
 0x73e   : > { %v2920_v0 = vadd.f32 %v2904_v23, %v2884_v12  ;;  %v3652_v63 = vpop.f32.mrb[42].mxu0 }
 0x73f   : > { %2938 = vst.msk [vmem:[%s5175_s13 + $0x18] sm:$0xff] %vm2934_vm1, %v2921_v59  ;;  %v2907_v18 = vmul.f32 %v3652_v63, %v5164_v40  ;;  %v2818_v26 = vpop.f32.mrb[43].mxu0 }
 0x740   : > { %2937 = vst.msk [vmem:[%s5175_s13 + $0x10] sm:$0xff] %vm2934_vm1, %v2920_v0  ;;  %v2906_v16 = vmul.f32 %v5164_v40, %v2818_v26  ;;  %v2896_v0 = vmul.f32 %v5160_v46, %v1072_v61 }
 0x741   : > { %v2923_v54 = vadd.f32 %v2907_v18, %v2887_v31 }
 0x742   : > { %v2922_v48 = vadd.f32 %v2906_v16, %v2886_v32  ;;  %v3655_v3 = vpop.f32.mrb[44].mxu0 }
 0x743   : > { %2940 = vst.msk [vmem:[%s5175_s13 + $0x28] sm:$0xff] %vm2934_vm1, %v2923_v54  ;;  %v2909_v10 = vmul.f32 %v3655_v3, %v5164_v40  ;;  %v2828_v39 = vpop.f32.mrb[45].mxu0 }
 0x744   : > { %2939 = vst.msk [vmem:[%s5175_s13 + $0x20] sm:$0xff] %vm2934_vm1, %v2922_v48  ;;  %v2908_v62 = vmul.f32 %v5164_v40, %v2828_v39 }
 0x745   : > { %v2925_v8 = vadd.f32 %v2909_v10, %v2889_v25 }
 0x746   : > { %v2924_v20 = vadd.f32 %v2908_v62, %v2888_v29  ;;  %v3658_v11 = vpop.f32.mrb[46].mxu0 }
 0x747   : > { %2942 = vst.msk [vmem:[%s5175_s13 + $0x38] sm:$0xff] %vm2934_vm1, %v2925_v8  ;;  %v2911_v14 = vmul.f32 %v3658_v11, %v5164_v40  ;;  %v2838_v21 = vpop.f32.mrb[47].mxu0 }
 0x748   : > { %2941 = vst.msk [vmem:[%s5175_s13 + $0x30] sm:$0xff] %vm2934_vm1, %v2924_v20  ;;  %v2910_v6 = vmul.f32 %v5164_v40, %v2838_v21 }
 0x749   : > { %v2927_v4 = vadd.f32 %v2911_v14, %v2891_v7 }
 0x74a   : > { %v2926_v58 = vadd.f32 %v2910_v6, %v2890_v15  ;;  %v3661_v55 = vpop.f32.mrb[48].mxu0 }
 0x74b   : > { %2944 = vst.msk [vmem:[%s5175_s13 + $0x48] sm:$0xff] %vm2934_vm1, %v2927_v4  ;;  %v2913_v36 = vmul.f32 %v3661_v55, %v5164_v40  ;;  %v2848_v45 = vpop.f32.mrb[49].mxu0 }
 0x74c   : > { %2943 = vst.msk [vmem:[%s5175_s13 + $0x40] sm:$0xff] %vm2934_vm1, %v2926_v58  ;;  %v2912_v9 = vmul.f32 %v5164_v40, %v2848_v45 }
 0x74d   : > { %v2929_v27 = vadd.f32 %v2913_v36, %v2893_v47 }
 0x74e   : > { %v2928_v19 = vadd.f32 %v2912_v9, %v2892_v37  ;;  %v3664_v42 = vpop.f32.mrb[50].mxu0 }
 0x74f   : > { %2946 = vst.msk [vmem:[%s5175_s13 + $0x58] sm:$0xff] %vm2934_vm1, %v2929_v27  ;;  %v2915_v1 = vmul.f32 %v3664_v42, %v5164_v40  ;;  %v2858_v17 = vpop.f32.mrb[51].mxu0 }
 0x750   : > { %2945 = vst.msk [vmem:[%s5175_s13 + $0x50] sm:$0xff] %vm2934_vm1, %v2928_v19  ;;  %v2914_v35 = vmul.f32 %v5164_v40, %v2858_v17 }
 0x751   : > { %v2931_v49 = vadd.f32 %v2915_v1, %v2895_v38 }
 0x752   : > { %v2930_v50 = vadd.f32 %v2914_v35, %v2894_v56  ;;  %v3667_v12 = vpop.f32.mrb[52].mxu0 }
 0x753   : > { %2948 = vst.msk [vmem:[%s5175_s13 + $0x68] sm:$0xff] %vm2934_vm1, %v2931_v49  ;;  %v2917_v23 = vmul.f32 %v3667_v12, %v5164_v40  ;;  %v2868_v59 = vpop.f32.mrb[53].mxu0 }
 0x754   : > { %2947 = vst.msk [vmem:[%s5175_s13 + $0x60] sm:$0xff] %vm2934_vm1, %v2930_v50  ;;  %v2916_v44 = vmul.f32 %v5164_v40, %v2868_v59 }
 0x755   : > { %v2933_v63 = vadd.f32 %v2917_v23, %v2897_v24 }
 0x756   : > { %v2932_v31 = vadd.f32 %v2916_v44, %v2896_v0 }
 0x757   : > { %2950 = vst.msk [vmem:[%s5175_s13 + $0x78] sm:$0xff] %vm2934_vm1, %v2933_v63 }
 0x758   : > { %2949 = vst.msk [vmem:[%s5175_s13 + $0x70] sm:$0xff] %vm2934_vm1, %v2932_v31 }
 0x759 PF: > { %s23_s19 = sadd.s32 1, %s3888_s19  }
 0x75a   : > { %p20_p4 = scmp.ge.s32.totalorder %s23_s19, 4  }
 0x75c   :  { %22 = sbr.rel (!%p20_p4) target bundleno = 3 (0x3), region = 94 }

</bundles_post_ra>
